<compile_context>
chip_gen: v7x
topology: tpu7x:2x2x1
jax: 0.10.0
libtpu: 0.0.40
codegen_flags: <defaults>
</compile_context>

<pallas_src>
import functools
from typing import NamedTuple

import jax
import jax.numpy as jnp
from jax.experimental import pallas as pl
from jax.experimental.pallas import tpu as pltpu

# Conservative scoped-VMEM budget: fits the default limit on v6e/v7x and stays well
# under every generation's physical VMEM; raise per-generation after profiling.
_VMEM_LIMIT = 32 * 1024 * 1024


class Config(NamedTuple):
    patch_size: int
    embed_dim: int
    num_heads: int
    num_reg: int


def _round_up(x, m):
    return (x + m - 1) // m * m


def _row_tile(m, cap=512):
    """Largest row tile <= cap that divides m and is a sublane (8) multiple."""
    for t in (512, 256, 128, 64, 32, 16, 8):
        if t <= cap and m % t == 0:
            return t
    return m  # fall back to a single full block (always legal)


def _cparams(parallel=True):
    return pltpu.CompilerParams(
        dimension_semantics=("parallel",) if parallel else ("arbitrary",),
        vmem_limit_bytes=_VMEM_LIMIT,
    )


# ----------------------------------------------------------------------------- kernels
def _matmul_bias_kernel(x_ref, w_ref, b_ref, o_ref):
    y = jnp.dot(x_ref[...].astype(jnp.bfloat16), w_ref[...],
                preferred_element_type=jnp.float32) + b_ref[...]
    o_ref[...] = y.astype(o_ref.dtype)


def _ln_matmul_kernel(x_ref, g_ref, b_ref, w_ref, wb_ref, o_ref, *, eps):
    x = x_ref[...]                                            # f32 (tm, D)
    mu = jnp.mean(x, axis=-1, keepdims=True)
    var = jnp.mean(jnp.square(x - mu), axis=-1, keepdims=True)
    y = (x - mu) * jax.lax.rsqrt(var + eps) * g_ref[...] + b_ref[...]
    out = jnp.dot(y.astype(jnp.bfloat16), w_ref[...],
                  preferred_element_type=jnp.float32) + wb_ref[...]
    o_ref[...] = out.astype(o_ref.dtype)


def _mlp_block_kernel(x_ref, g_ref, b_ref, w1_ref, b1_ref, w2_ref, b2_ref,
                      ls_ref, o_ref, *, eps):
    x = x_ref[...]                                            # f32 residual stream
    mu = jnp.mean(x, axis=-1, keepdims=True)
    var = jnp.mean(jnp.square(x - mu), axis=-1, keepdims=True)
    y = (x - mu) * jax.lax.rsqrt(var + eps) * g_ref[...] + b_ref[...]
    h = jnp.dot(y.astype(jnp.bfloat16), w1_ref[...],
                preferred_element_type=jnp.float32) + b1_ref[...]
    # TODO(synk): PyTorch nn.GELU defaults to the exact erf form; tanh approximation used here.
    h = jax.nn.gelu(h, approximate=True)
    out = jnp.dot(h.astype(jnp.bfloat16), w2_ref[...],
                  preferred_element_type=jnp.float32) + b2_ref[...]
    o_ref[...] = x + out * ls_ref[...]


def _attn_proj_kernel(qkv_ref, x_ref, pw_ref, pb_ref, ls_ref, o_ref, *,
                      nh, dh, scale, t_valid):
    qkv = qkv_ref[0]                                          # bf16 (Tp, 3D)
    x = x_ref[0]                                              # f32  (Tp, D) residual
    tp = qkv.shape[0]
    d = nh * dh
    heads = []
    for h in range(nh):                                       # static unroll over heads
        qh = (qkv[:, h * dh:(h + 1) * dh].astype(jnp.float32) * scale
              ).astype(jnp.bfloat16)                          # scale folded into q
        kh = qkv[:, d + h * dh:d + (h + 1) * dh]
        vh = qkv[:, 2 * d + h * dh:2 * d + (h + 1) * dh]
        s = jax.lax.dot_general(qh, kh, (((1,), (1,)), ((), ())),
                                preferred_element_type=jnp.float32)   # (Tp, Tp) f32
        if t_valid < tp:                                      # mask padded key tokens
            key_idx = jax.lax.broadcasted_iota(jnp.int32, (tp, tp), 1)
            s = jnp.where(key_idx < t_valid, s, -1e30)
        m = jnp.max(s, axis=-1, keepdims=True)
        p = jnp.exp(s - m)
        p = p * pl.reciprocal(jnp.sum(p, axis=-1, keepdims=True), approx=True)
        heads.append(jnp.dot(p.astype(jnp.bfloat16), vh,
                             preferred_element_type=jnp.float32))
    o = jnp.concatenate(heads, axis=-1)                       # (Tp, D) f32
    o = jnp.dot(o.astype(jnp.bfloat16), pw_ref[...],
                preferred_element_type=jnp.float32) + pb_ref[...]
    o_ref[0] = x + o * ls_ref[...]


def _head_softmax_kernel(x_ref, g_ref, b_ref, w_ref, wb_ref, o_ref, *, eps):
    x = x_ref[...]                                            # (B, D) CLS features
    mu = jnp.mean(x, axis=-1, keepdims=True)
    var = jnp.mean(jnp.square(x - mu), axis=-1, keepdims=True)
    y = (x - mu) * jax.lax.rsqrt(var + eps) * g_ref[...] + b_ref[...]
    logits = jnp.dot(y.astype(jnp.bfloat16), w_ref[...],
                     preferred_element_type=jnp.float32) + wb_ref[...]
    m = jnp.max(logits, axis=-1, keepdims=True)
    e = jnp.exp(logits - m)
    o_ref[...] = e / jnp.sum(e, axis=-1, keepdims=True)       # exact div for prob sums


# ----------------------------------------------------------------------------- wrappers
def patch_embed(x2d, w_bf16, b):
    M, K = x2d.shape
    N = w_bf16.shape[1]
    tm = _row_tile(M)
    return pl.pallas_call(
        _matmul_bias_kernel,
        grid=(M // tm,),
        in_specs=[pl.BlockSpec((tm, K), lambda i: (i, 0)),
                  pl.BlockSpec((K, N), lambda i: (0, 0)),
                  pl.BlockSpec((1, N), lambda i: (0, 0))],
        out_specs=pl.BlockSpec((tm, N), lambda i: (i, 0)),
        out_shape=jax.ShapeDtypeStruct((M, N), jnp.float32),
        compiler_params=_cparams(),
    )(x2d, w_bf16, b.reshape(1, N))


def ln_matmul(x2d, g, b, w_bf16, wb, eps=1e-6, out_dtype=jnp.bfloat16):
    M, D = x2d.shape
    N = w_bf16.shape[1]
    tm = _row_tile(M)
    return pl.pallas_call(
        functools.partial(_ln_matmul_kernel, eps=eps),
        grid=(M // tm,),
        in_specs=[pl.BlockSpec((tm, D), lambda i: (i, 0)),
                  pl.BlockSpec((1, D), lambda i: (0, 0)),
                  pl.BlockSpec((1, D), lambda i: (0, 0)),
                  pl.BlockSpec((D, N), lambda i: (0, 0)),
                  pl.BlockSpec((1, N), lambda i: (0, 0))],
        out_specs=pl.BlockSpec((tm, N), lambda i: (i, 0)),
        out_shape=jax.ShapeDtypeStruct((M, N), out_dtype),
        compiler_params=_cparams(),
    )(x2d, g.reshape(1, D), b.reshape(1, D), w_bf16, wb.reshape(1, N))


def mlp_block(x2d, g, b, w1_bf16, b1, w2_bf16, b2, ls, eps=1e-6):
    M, D = x2d.shape
    Hd = w1_bf16.shape[1]
    tm = _row_tile(M)
    return pl.pallas_call(
        functools.partial(_mlp_block_kernel, eps=eps),
        grid=(M // tm,),
        in_specs=[pl.BlockSpec((tm, D), lambda i: (i, 0)),
                  pl.BlockSpec((1, D), lambda i: (0, 0)),
                  pl.BlockSpec((1, D), lambda i: (0, 0)),
                  pl.BlockSpec((D, Hd), lambda i: (0, 0)),
                  pl.BlockSpec((1, Hd), lambda i: (0, 0)),
                  pl.BlockSpec((Hd, D), lambda i: (0, 0)),
                  pl.BlockSpec((1, D), lambda i: (0, 0)),
                  pl.BlockSpec((1, D), lambda i: (0, 0))],
        out_specs=pl.BlockSpec((tm, D), lambda i: (i, 0)),
        out_shape=jax.ShapeDtypeStruct((M, D), jnp.float32),
        input_output_aliases={0: 0},          # residual stream updated in place
        compiler_params=_cparams(),
    )(x2d, g.reshape(1, D), b.reshape(1, D), w1_bf16, b1.reshape(1, Hd),
      w2_bf16, b2.reshape(1, D), ls.reshape(1, D))


def attn_proj_block(qkv3, x3, pw_bf16, pb, ls, *, nh, dh, scale, t_valid):
    B, Tp, D3 = qkv3.shape
    D = nh * dh
    return pl.pallas_call(
        functools.partial(_attn_proj_kernel, nh=nh, dh=dh, scale=scale,
                          t_valid=t_valid),
        grid=(B,),
        in_specs=[pl.BlockSpec((1, Tp, D3), lambda b: (b, 0, 0)),
                  pl.BlockSpec((1, Tp, D), lambda b: (b, 0, 0)),
                  pl.BlockSpec((D, D), lambda b: (0, 0)),
                  pl.BlockSpec((1, D), lambda b: (0, 0)),
                  pl.BlockSpec((1, D), lambda b: (0, 0))],
        out_specs=pl.BlockSpec((1, Tp, D), lambda b: (b, 0, 0)),
        out_shape=jax.ShapeDtypeStruct((B, Tp, D), jnp.float32),
        input_output_aliases={1: 0},          # residual stream updated in place
        compiler_params=_cparams(),
    )(qkv3, x3, pw_bf16, pb.reshape(1, D), ls.reshape(1, D))


def head_softmax(feats, g, b, w_bf16, wb, eps=1e-6):
    B, D = feats.shape
    C = w_bf16.shape[1]
    return pl.pallas_call(
        functools.partial(_head_softmax_kernel, eps=eps),
        grid=(1,),
        in_specs=[pl.BlockSpec((B, D), lambda i: (0, 0)),
                  pl.BlockSpec((1, D), lambda i: (0, 0)),
                  pl.BlockSpec((1, D), lambda i: (0, 0)),
                  pl.BlockSpec((D, C), lambda i: (0, 0)),
                  pl.BlockSpec((1, C), lambda i: (0, 0))],
        out_specs=pl.BlockSpec((B, C), lambda i: (0, 0)),
        out_shape=jax.ShapeDtypeStruct((B, C), jnp.float32),
        compiler_params=_cparams(parallel=False),
    )(feats, g.reshape(1, D), b.reshape(1, D), w_bf16, wb.reshape(1, C))


# ----------------------------------------------------------------------------- model
def init_params(key, *, in_chans=3, patch_size=4, embed_dim=32, depth=2,
                num_heads=2, mlp_ratio=4, num_patches=16, num_reg=4, num_classes=8):
    ks = iter(jax.random.split(key, 8 + depth * 8))
    nrm = lambda shp: (0.02 * jax.random.normal(next(ks), shp)).astype(jnp.float32)
    bfw = lambda shp: nrm(shp).astype(jnp.bfloat16)     # MXU weights live in bf16
    zeros = lambda shp: jnp.zeros(shp, jnp.float32)
    ones = lambda shp: jnp.ones(shp, jnp.float32)
    hidden = embed_dim * mlp_ratio
    cfg = Config(patch_size=patch_size, embed_dim=embed_dim,
                 num_heads=num_heads, num_reg=num_reg)
    params = dict(
        patch_w=bfw((in_chans * patch_size * patch_size, embed_dim)),
        patch_b=zeros((embed_dim,)),
        cls_token=nrm((1, 1, embed_dim)),
        reg_tokens=nrm((1, num_reg, embed_dim)),
        pos_embed=nrm((1, 1 + num_patches, embed_dim)),
        norm_g=ones((embed_dim,)), norm_b=zeros((embed_dim,)),
        head_w=bfw((embed_dim, num_classes)), head_b=zeros((num_classes,)),
        blocks=[],
    )
    for _ in range(depth):
        params["blocks"].append(dict(
            ln1_g=ones((embed_dim,)), ln1_b=zeros((embed_dim,)),
            qkv_w=bfw((embed_dim, 3 * embed_dim)), qkv_b=zeros((3 * embed_dim,)),
            proj_w=bfw((embed_dim, embed_dim)), proj_b=zeros((embed_dim,)),
            ls1=ones((embed_dim,)),               # LayerScale
            ln2_g=ones((embed_dim,)), ln2_b=zeros((embed_dim,)),
            fc1_w=bfw((embed_dim, hidden)), fc1_b=zeros((hidden,)),
            fc2_w=bfw((hidden, embed_dim)), fc2_b=zeros((embed_dim,)),
            ls2=ones((embed_dim,)),
        ))
    return cfg, params


@functools.partial(jax.jit, static_argnums=0)
def dino_v2_forward(cfg, params, imgs):
    """Eval-mode forward: backbone(imgs) -> linear head -> softmax probabilities."""
    # TODO(synk): training branch (CrossEntropyLoss on labels) not implemented; eval path only.
    imgs = imgs.astype(jnp.float32)
    B, C, H, W = imgs.shape
    P, D = cfg.patch_size, cfg.embed_dim
    nH, nW = H // P, W // P
    nP = nH * nW

    # --- patch embedding: Conv2d(k=P, stride=P) == im2col + matmul ---
    # TODO(synk): at production shapes pad the contraction dim C*P*P (588) to a 128-multiple.
    patches = imgs.reshape(B, C, nH, P, nW, P).transpose(0, 2, 4, 1, 3, 5)
    patches = patches.reshape(B * nP, C * P * P)
    x = patch_embed(patches, params["patch_w"], params["patch_b"]).reshape(B, nP, D)

    # --- tokens: [cls] + pos_embed, then register tokens right after cls ---
    cls = jnp.broadcast_to(params["cls_token"], (B, 1, D))
    x = jnp.concatenate([cls, x], axis=1) + params["pos_embed"]
    reg = jnp.broadcast_to(params["reg_tokens"], (B, cfg.num_reg, D))
    x = jnp.concatenate([x[:, :1], reg, x[:, 1:]], axis=1)

    T = x.shape[1]
    # Pad the token axis: lane-dense (128) attention-score tiles at production T,
    # sublane (8) alignment at tiny toy T.  Padded keys are masked inside the kernel.
    Tp = _round_up(T, 128) if T > 64 else _round_up(T, 8)
    if Tp > T:
        x = jnp.pad(x, ((0, 0), (0, Tp - T), (0, 0)))

    nh = cfg.num_heads
    dh = D // nh
    scale = dh ** -0.5

    x2 = x.reshape(B * Tp, D)                       # residual stream, f32
    for blk in params["blocks"]:
        qkv = ln_matmul(x2, blk["ln1_g"], blk["ln1_b"], blk["qkv_w"], blk["qkv_b"])
        x2 = attn_proj_block(qkv.reshape(B, Tp, 3 * D), x2.reshape(B, Tp, D),
                             blk["proj_w"], blk["proj_b"], blk["ls1"],
                             nh=nh, dh=dh, scale=scale, t_valid=T).reshape(B * Tp, D)
        x2 = mlp_block(x2, blk["ln2_g"], blk["ln2_b"], blk["fc1_w"], blk["fc1_b"],
                       blk["fc2_w"], blk["fc2_b"], blk["ls2"])

    # Final LayerNorm is per-token, so apply it (fused with head + class softmax)
    # to the CLS token only == x_norm_clstoken path of dinov2.
    feats = x2.reshape(B, Tp, D)[:, 0, :]            # (B, D)
    return head_softmax(feats, params["norm_g"], params["norm_b"],
                        params["head_w"], params["head_b"])


if __name__ == "__main__":
    key = jax.random.PRNGKey(0)
    kp, kx = jax.random.split(key)
    # small shapes consistent with the forward: NCHW images, 4x4 patches -> 16 patches
    imgs = jax.random.normal(kx, (2, 3, 16, 16), dtype=jnp.float32)
    cfg, params = init_params(kp)
    probs = dino_v2_forward(cfg, params, imgs)
    probs = jax.block_until_ready(probs)
    assert probs.shape == (2, 8)
    assert bool(jnp.all(jnp.isfinite(probs)))
    assert bool(jnp.allclose(jnp.sum(probs, axis=-1), 1.0, atol=1e-5))
    print("KERNEL_OK")
</pallas_src>

<mosaic_0001>
module attributes {stable_mosaic.version = 11 : i64} {
  func.func @_matmul_bias_kernel(%arg0: i32, %arg1: memref<32x48xf32, #tpu.memory_space<vmem>>, %arg2: memref<48x32xbf16, #tpu.memory_space<vmem>>, %arg3: memref<1x32xf32, #tpu.memory_space<vmem>>, %arg4: memref<32x32xf32, #tpu.memory_space<vmem>>) attributes {dimension_semantics = [#tpu.dimension_semantics<parallel>], iteration_bounds = array<i64: 1>, scalar_prefetch = 0 : i64, scratch_operands = 0 : i64, tpu.core_type = #tpu.core_type<tc>, window_params = [{transform_indices = @transform_0, window_bounds = array<i64: 32, 48>}, {pipeline_mode = #tpu.pipeline_mode<synchronous>, transform_indices = @transform_1, window_bounds = array<i64: 48, 32>}, {pipeline_mode = #tpu.pipeline_mode<synchronous>, transform_indices = @transform_2, window_bounds = array<i64: 1, 32>}, {transform_indices = @transform_3, window_bounds = array<i64: 32, 32>}]} {
    %c0 = arith.constant 0 : index
    %c0_0 = arith.constant 0 : index
    %0 = vector.load %arg1[%c0, %c0_0] : memref<32x48xf32, #tpu.memory_space<vmem>>, vector<32x48xf32>
    %1 = arith.truncf %0 : vector<32x48xf32> to vector<32x48xbf16>
    %c0_1 = arith.constant 0 : index
    %c0_2 = arith.constant 0 : index
    %2 = vector.load %arg2[%c0_1, %c0_2] : memref<48x32xbf16, #tpu.memory_space<vmem>>, vector<48x32xbf16>
    %cst = arith.constant dense<0.000000e+00> : vector<32x32xf32>
    %3 = tpu.matmul %1, %2, %cst {dimension_numbers = #tpu.dot_dimension_numbers<[1], [0], [0], [1], [0, 0, 1, 1], [], []>} : vector<32x48xbf16>, vector<48x32xbf16>, vector<32x32xf32> -> vector<32x32xf32>
    %c0_3 = arith.constant 0 : index
    %c0_4 = arith.constant 0 : index
    %4 = vector.load %arg3[%c0_3, %c0_4] : memref<1x32xf32, #tpu.memory_space<vmem>>, vector<1x32xf32>
    %5 = vector.broadcast %4 : vector<1x32xf32> to vector<32x32xf32>
    %6 = arith.addf %3, %5 : vector<32x32xf32>
    %c0_5 = arith.constant 0 : index
    %c0_6 = arith.constant 0 : index
    %7 = vector.load %arg4[%c0_5, %c0_6] : memref<32x32xf32, #tpu.memory_space<vmem>>, vector<32x32xf32>
    tpu.vector_store %arg4[%c0_5, %c0_6], %6 {strides = array<i32>} : memref<32x32xf32, #tpu.memory_space<vmem>>, vector<32x32xf32>,
    return
  }
  func.func @transform_0(%arg0: i32) -> (i32, i32) {
    %c0_i32 = arith.constant 0 : i32
    %c0_i32_0 = arith.constant 0 : i32
    return %arg0, %c0_i32 : i32, i32
  }
  func.func @transform_1(%arg0: i32) -> (i32, i32) {
    %c0_i32 = arith.constant 0 : i32
    %c0_i32_0 = arith.constant 0 : i32
    %c0_i32_1 = arith.constant 0 : i32
    return %c0_i32, %c0_i32_0 : i32, i32
  }
  func.func @transform_2(%arg0: i32) -> (i32, i32) {
    %c0_i32 = arith.constant 0 : i32
    %c0_i32_0 = arith.constant 0 : i32
    %c0_i32_1 = arith.constant 0 : i32
    return %c0_i32, %c0_i32_0 : i32, i32
  }
  func.func @transform_3(%arg0: i32) -> (i32, i32) {
    %c0_i32 = arith.constant 0 : i32
    %c0_i32_0 = arith.constant 0 : i32
    return %arg0, %c0_i32 : i32, i32
  }
}

module attributes {stable_mosaic.version = 11 : i64} {
  func.func @_ln_matmul_kernel(%arg0: i32, %arg1: memref<16x32xf32, #tpu.memory_space<vmem>>, %arg2: memref<1x32xf32, #tpu.memory_space<vmem>>, %arg3: memref<1x32xf32, #tpu.memory_space<vmem>>, %arg4: memref<32x96xbf16, #tpu.memory_space<vmem>>, %arg5: memref<1x96xf32, #tpu.memory_space<vmem>>, %arg6: memref<16x96xbf16, #tpu.memory_space<vmem>>) attributes {dimension_semantics = [#tpu.dimension_semantics<parallel>], iteration_bounds = array<i64: 3>, scalar_prefetch = 0 : i64, scratch_operands = 0 : i64, tpu.core_type = #tpu.core_type<tc>, window_params = [{transform_indices = @transform_0, window_bounds = array<i64: 16, 32>}, {pipeline_mode = #tpu.pipeline_mode<synchronous>, transform_indices = @transform_1, window_bounds = array<i64: 1, 32>}, {pipeline_mode = #tpu.pipeline_mode<synchronous>, transform_indices = @transform_2, window_bounds = array<i64: 1, 32>}, {pipeline_mode = #tpu.pipeline_mode<synchronous>, transform_indices = @transform_3, window_bounds = array<i64: 32, 96>}, {pipeline_mode = #tpu.pipeline_mode<synchronous>, transform_indices = @transform_4, window_bounds = array<i64: 1, 96>}, {transform_indices = @transform_5, window_bounds = array<i64: 16, 96>}]} {
    %c0 = arith.constant 0 : index
    %c0_0 = arith.constant 0 : index
    %0 = vector.load %arg1[%c0, %c0_0] : memref<16x32xf32, #tpu.memory_space<vmem>>, vector<16x32xf32>
    %cst = arith.constant dense<0.000000e+00> : vector<16xf32>
    %1 = vector.multi_reduction <add>, %0, %cst [1] : vector<16x32xf32> to vector<16xf32>
    %2 = vector.shape_cast %1 : vector<16xf32> to vector<16x1xf32>
    %cst_1 = arith.constant 3.200000e+01 : f32
    %3 = vector.broadcast %cst_1 : f32 to vector<16x1xf32>
    %4 = arith.divf %2, %3 : vector<16x1xf32>
    %5 = vector.broadcast %4 : vector<16x1xf32> to vector<16x32xf32>
    %6 = arith.subf %0, %5 : vector<16x32xf32>
    %7 = arith.mulf %6, %6 : vector<16x32xf32>
    %cst_2 = arith.constant dense<0.000000e+00> : vector<16xf32>
    %8 = vector.multi_reduction <add>, %7, %cst_2 [1] : vector<16x32xf32> to vector<16xf32>
    %9 = vector.shape_cast %8 : vector<16xf32> to vector<16x1xf32>
    %cst_3 = arith.constant 3.200000e+01 : f32
    %10 = vector.broadcast %cst_3 : f32 to vector<16x1xf32>
    %11 = arith.divf %9, %10 : vector<16x1xf32>
    %12 = vector.broadcast %4 : vector<16x1xf32> to vector<16x32xf32>
    %13 = arith.subf %0, %12 : vector<16x32xf32>
    %cst_4 = arith.constant 9.99999997E-7 : f32
    %14 = vector.broadcast %cst_4 : f32 to vector<16x1xf32>
    %15 = arith.addf %11, %14 : vector<16x1xf32>
    %16 = math.rsqrt %15 : vector<16x1xf32>
    %17 = vector.broadcast %16 : vector<16x1xf32> to vector<16x32xf32>
    %18 = arith.mulf %13, %17 : vector<16x32xf32>
    %c0_5 = arith.constant 0 : index
    %c0_6 = arith.constant 0 : index
    %19 = vector.load %arg2[%c0_5, %c0_6] : memref<1x32xf32, #tpu.memory_space<vmem>>, vector<1x32xf32>
    %20 = vector.broadcast %19 : vector<1x32xf32> to vector<16x32xf32>
    %21 = arith.mulf %18, %20 : vector<16x32xf32>
    %c0_7 = arith.constant 0 : index
    %c0_8 = arith.constant 0 : index
    %22 = vector.load %arg3[%c0_7, %c0_8] : memref<1x32xf32, #tpu.memory_space<vmem>>, vector<1x32xf32>
    %23 = vector.broadcast %22 : vector<1x32xf32> to vector<16x32xf32>
    %24 = arith.addf %21, %23 : vector<16x32xf32>
    %25 = arith.truncf %24 : vector<16x32xf32> to vector<16x32xbf16>
    %c0_9 = arith.constant 0 : index
    %c0_10 = arith.constant 0 : index
    %26 = vector.load %arg4[%c0_9, %c0_10] : memref<32x96xbf16, #tpu.memory_space<vmem>>, vector<32x96xbf16>
    %cst_11 = arith.constant dense<0.000000e+00> : vector<16x96xf32>
    %27 = tpu.matmul %25, %26, %cst_11 {dimension_numbers = #tpu.dot_dimension_numbers<[1], [0], [0], [1], [0, 0, 1, 1], [], []>} : vector<16x32xbf16>, vector<32x96xbf16>, vector<16x96xf32> -> vector<16x96xf32>
    %c0_12 = arith.constant 0 : index
    %c0_13 = arith.constant 0 : index
    %28 = vector.load %arg5[%c0_12, %c0_13] : memref<1x96xf32, #tpu.memory_space<vmem>>, vector<1x96xf32>
    %29 = vector.broadcast %28 : vector<1x96xf32> to vector<16x96xf32>
    %30 = arith.addf %27, %29 : vector<16x96xf32>
    %31 = arith.truncf %30 : vector<16x96xf32> to vector<16x96xbf16>
    %c0_14 = arith.constant 0 : index
    %c0_15 = arith.constant 0 : index
    %32 = vector.load %arg6[%c0_14, %c0_15] : memref<16x96xbf16, #tpu.memory_space<vmem>>, vector<16x96xbf16>
    tpu.vector_store %arg6[%c0_14, %c0_15], %31 {strides = array<i32>} : memref<16x96xbf16, #tpu.memory_space<vmem>>, vector<16x96xbf16>,
    return
  }
  func.func @transform_0(%arg0: i32) -> (i32, i32) {
    %c0_i32 = arith.constant 0 : i32
    %c0_i32_0 = arith.constant 0 : i32
    return %arg0, %c0_i32 : i32, i32
  }
  func.func @transform_1(%arg0: i32) -> (i32, i32) {
    %c0_i32 = arith.constant 0 : i32
    %c0_i32_0 = arith.constant 0 : i32
    %c0_i32_1 = arith.constant 0 : i32
    return %c0_i32, %c0_i32_0 : i32, i32
  }
  func.func @transform_2(%arg0: i32) -> (i32, i32) {
    %c0_i32 = arith.constant 0 : i32
    %c0_i32_0 = arith.constant 0 : i32
    %c0_i32_1 = arith.constant 0 : i32
    return %c0_i32, %c0_i32_0 : i32, i32
  }
  func.func @transform_3(%arg0: i32) -> (i32, i32) {
    %c0_i32 = arith.constant 0 : i32
    %c0_i32_0 = arith.constant 0 : i32
    %c0_i32_1 = arith.constant 0 : i32
    return %c0_i32, %c0_i32_0 : i32, i32
  }
  func.func @transform_4(%arg0: i32) -> (i32, i32) {
    %c0_i32 = arith.constant 0 : i32
    %c0_i32_0 = arith.constant 0 : i32
    %c0_i32_1 = arith.constant 0 : i32
    return %c0_i32, %c0_i32_0 : i32, i32
  }
  func.func @transform_5(%arg0: i32) -> (i32, i32) {
    %c0_i32 = arith.constant 0 : i32
    %c0_i32_0 = arith.constant 0 : i32
    return %arg0, %c0_i32 : i32, i32
  }
}

module attributes {stable_mosaic.version = 11 : i64} {
  func.func @_attn_proj_kernel(%arg0: i32, %arg1: memref<1x24x96xbf16, #tpu.memory_space<vmem>>, %arg2: memref<1x24x32xf32, #tpu.memory_space<vmem>>, %arg3: memref<32x32xbf16, #tpu.memory_space<vmem>>, %arg4: memref<1x32xf32, #tpu.memory_space<vmem>>, %arg5: memref<1x32xf32, #tpu.memory_space<vmem>>, %arg6: memref<1x24x32xf32, #tpu.memory_space<vmem>>) attributes {dimension_semantics = [#tpu.dimension_semantics<parallel>], iteration_bounds = array<i64: 2>, scalar_prefetch = 0 : i64, scratch_operands = 0 : i64, tpu.core_type = #tpu.core_type<tc>, window_params = [{transform_indices = @transform_0, window_bounds = array<i64: 1, 24, 96>}, {transform_indices = @transform_1, window_bounds = array<i64: 1, 24, 32>}, {pipeline_mode = #tpu.pipeline_mode<synchronous>, transform_indices = @transform_2, window_bounds = array<i64: 32, 32>}, {pipeline_mode = #tpu.pipeline_mode<synchronous>, transform_indices = @transform_3, window_bounds = array<i64: 1, 32>}, {pipeline_mode = #tpu.pipeline_mode<synchronous>, transform_indices = @transform_4, window_bounds = array<i64: 1, 32>}, {transform_indices = @transform_5, window_bounds = array<i64: 1, 24, 32>}]} {
    %c0 = arith.constant 0 : index
    %c0_0 = arith.constant 0 : index
    %c0_1 = arith.constant 0 : index
    %0 = vector.load %arg1[%c0, %c0_0, %c0_1] : memref<1x24x96xbf16, #tpu.memory_space<vmem>>, vector<1x24x96xbf16>
    %1 = vector.shape_cast %0 : vector<1x24x96xbf16> to vector<24x96xbf16>
    %c0_2 = arith.constant 0 : index
    %c0_3 = arith.constant 0 : index
    %c0_4 = arith.constant 0 : index
    %2 = vector.load %arg2[%c0_2, %c0_3, %c0_4] : memref<1x24x32xf32, #tpu.memory_space<vmem>>, vector<1x24x32xf32>
    %3 = vector.shape_cast %2 : vector<1x24x32xf32> to vector<24x32xf32>
    %4 = vector.extract_strided_slice %1 {offsets = [0, 0], sizes = [24, 16], strides = [1, 1]} : vector<24x96xbf16> to vector<24x16xbf16>
    %5 = arith.extf %4 : vector<24x16xbf16> to vector<24x16xf32>
    %cst = arith.constant 2.500000e-01 : f32
    %6 = vector.broadcast %cst : f32 to vector<24x16xf32>
    %7 = arith.mulf %5, %6 : vector<24x16xf32>
    %8 = arith.truncf %7 : vector<24x16xf32> to vector<24x16xbf16>
    %9 = vector.extract_strided_slice %1 {offsets = [0, 32], sizes = [24, 16], strides = [1, 1]} : vector<24x96xbf16> to vector<24x16xbf16>
    %10 = vector.extract_strided_slice %1 {offsets = [0, 64], sizes = [24, 16], strides = [1, 1]} : vector<24x96xbf16> to vector<24x16xbf16>
    %cst_5 = arith.constant dense<0.000000e+00> : vector<24x24xf32>
    %11 = tpu.matmul %8, %9, %cst_5 {dimension_numbers = #tpu.dot_dimension_numbers<[1], [1], [0], [0], [0, 0, 1, 0], [], []>} : vector<24x16xbf16>, vector<24x16xbf16>, vector<24x24xf32> -> vector<24x24xf32>
    %12 = tpu.iota {dimensions = array<i32: 1>} : vector<24x24xi32>
    %c21_i32 = arith.constant 21 : i32
    %13 = vector.broadcast %c21_i32 : i32 to vector<24x24xi32>
    %14 = arith.cmpi slt, %12, %13 : vector<24x24xi32>
    %cst_6 = arith.constant -1.000000e+30 : f32
    %15 = vector.broadcast %cst_6 : f32 to vector<24x24xf32>
    %16 = arith.select %14, %11, %15 : vector<24x24xi1>, vector<24x24xf32>
    %cst_7 = arith.constant dense<0xFF800000> : vector<24xf32>
    %17 = vector.multi_reduction <maximumf>, %16, %cst_7 [1] : vector<24x24xf32> to vector<24xf32>
    %18 = vector.shape_cast %17 : vector<24xf32> to vector<24x1xf32>
    %19 = vector.broadcast %18 : vector<24x1xf32> to vector<24x24xf32>
    %20 = arith.subf %16, %19 : vector<24x24xf32>
    %21 = math.exp %20 : vector<24x24xf32>
    %cst_8 = arith.constant dense<0.000000e+00> : vector<24xf32>
    %22 = vector.multi_reduction <add>, %21, %cst_8 [1] : vector<24x24xf32> to vector<24xf32>
    %23 = vector.shape_cast %22 : vector<24xf32> to vector<24x1xf32>
    %24 = tpu.reciprocal %23 {approx = true} : vector<24x1xf32> -> vector<24x1xf32>
    %25 = vector.broadcast %24 : vector<24x1xf32> to vector<24x24xf32>
    %26 = arith.mulf %21, %25 : vector<24x24xf32>
    %27 = arith.truncf %26 : vector<24x24xf32> to vector<24x24xbf16>
    %cst_9 = arith.constant dense<0.000000e+00> : vector<24x16xf32>
    %28 = tpu.matmul %27, %10, %cst_9 {dimension_numbers = #tpu.dot_dimension_numbers<[1], [0], [0], [1], [0, 0, 1, 1], [], []>} : vector<24x24xbf16>, vector<24x16xbf16>, vector<24x16xf32> -> vector<24x16xf32>
    %29 = vector.extract_strided_slice %1 {offsets = [0, 16], sizes = [24, 16], strides = [1, 1]} : vector<24x96xbf16> to vector<24x16xbf16>
    %30 = arith.extf %29 : vector<24x16xbf16> to vector<24x16xf32>
    %cst_10 = arith.constant 2.500000e-01 : f32
    %31 = vector.broadcast %cst_10 : f32 to vector<24x16xf32>
    %32 = arith.mulf %30, %31 : vector<24x16xf32>
    %33 = arith.truncf %32 : vector<24x16xf32> to vector<24x16xbf16>
    %34 = vector.extract_strided_slice %1 {offsets = [0, 48], sizes = [24, 16], strides = [1, 1]} : vector<24x96xbf16> to vector<24x16xbf16>
    %35 = vector.extract_strided_slice %1 {offsets = [0, 80], sizes = [24, 16], strides = [1, 1]} : vector<24x96xbf16> to vector<24x16xbf16>
    %cst_11 = arith.constant dense<0.000000e+00> : vector<24x24xf32>
    %36 = tpu.matmul %33, %34, %cst_11 {dimension_numbers = #tpu.dot_dimension_numbers<[1], [1], [0], [0], [0, 0, 1, 0], [], []>} : vector<24x16xbf16>, vector<24x16xbf16>, vector<24x24xf32> -> vector<24x24xf32>
    %37 = tpu.iota {dimensions = array<i32: 1>} : vector<24x24xi32>
    %c21_i32_12 = arith.constant 21 : i32
    %38 = vector.broadcast %c21_i32_12 : i32 to vector<24x24xi32>
    %39 = arith.cmpi slt, %37, %38 : vector<24x24xi32>
    %cst_13 = arith.constant -1.000000e+30 : f32
    %40 = vector.broadcast %cst_13 : f32 to vector<24x24xf32>
    %41 = arith.select %39, %36, %40 : vector<24x24xi1>, vector<24x24xf32>
    %cst_14 = arith.constant dense<0xFF800000> : vector<24xf32>
    %42 = vector.multi_reduction <maximumf>, %41, %cst_14 [1] : vector<24x24xf32> to vector<24xf32>
    %43 = vector.shape_cast %42 : vector<24xf32> to vector<24x1xf32>
    %44 = vector.broadcast %43 : vector<24x1xf32> to vector<24x24xf32>
    %45 = arith.subf %41, %44 : vector<24x24xf32>
    %46 = math.exp %45 : vector<24x24xf32>
    %cst_15 = arith.constant dense<0.000000e+00> : vector<24xf32>
    %47 = vector.multi_reduction <add>, %46, %cst_15 [1] : vector<24x24xf32> to vector<24xf32>
    %48 = vector.shape_cast %47 : vector<24xf32> to vector<24x1xf32>
    %49 = tpu.reciprocal %48 {approx = true} : vector<24x1xf32> -> vector<24x1xf32>
    %50 = vector.broadcast %49 : vector<24x1xf32> to vector<24x24xf32>
    %51 = arith.mulf %46, %50 : vector<24x24xf32>
    %52 = arith.truncf %51 : vector<24x24xf32> to vector<24x24xbf16>
    %cst_16 = arith.constant dense<0.000000e+00> : vector<24x16xf32>
    %53 = tpu.matmul %52, %35, %cst_16 {dimension_numbers = #tpu.dot_dimension_numbers<[1], [0], [0], [1], [0, 0, 1, 1], [], []>} : vector<24x24xbf16>, vector<24x16xbf16>, vector<24x16xf32> -> vector<24x16xf32>
    %54 = tpu.concatenate %28, %53 in 1 : vector<24x16xf32>, vector<24x16xf32> -> vector<24x32xf32>
    %55 = arith.truncf %54 : vector<24x32xf32> to vector<24x32xbf16>
    %c0_17 = arith.constant 0 : index
    %c0_18 = arith.constant 0 : index
    %56 = vector.load %arg3[%c0_17, %c0_18] : memref<32x32xbf16, #tpu.memory_space<vmem>>, vector<32x32xbf16>
    %cst_19 = arith.constant dense<0.000000e+00> : vector<24x32xf32>
    %57 = tpu.matmul %55, %56, %cst_19 {dimension_numbers = #tpu.dot_dimension_numbers<[1], [0], [0], [1], [0, 0, 1, 1], [], []>} : vector<24x32xbf16>, vector<32x32xbf16>, vector<24x32xf32> -> vector<24x32xf32>
    %c0_20 = arith.constant 0 : index
    %c0_21 = arith.constant 0 : index
    %58 = vector.load %arg4[%c0_20, %c0_21] : memref<1x32xf32, #tpu.memory_space<vmem>>, vector<1x32xf32>
    %59 = vector.broadcast %58 : vector<1x32xf32> to vector<24x32xf32>
    %60 = arith.addf %57, %59 : vector<24x32xf32>
    %c0_22 = arith.constant 0 : index
    %c0_23 = arith.constant 0 : index
    %61 = vector.load %arg5[%c0_22, %c0_23] : memref<1x32xf32, #tpu.memory_space<vmem>>, vector<1x32xf32>
    %62 = vector.broadcast %61 : vector<1x32xf32> to vector<24x32xf32>
    %63 = arith.mulf %60, %62 : vector<24x32xf32>
    %64 = arith.addf %3, %63 : vector<24x32xf32>
    %c0_24 = arith.constant 0 : index
    %c0_25 = arith.constant 0 : index
    %c0_26 = arith.constant 0 : index
    %65 = vector.load %arg6[%c0_24, %c0_25, %c0_26] : memref<1x24x32xf32, #tpu.memory_space<vmem>>, vector<1x24x32xf32>
    %66 = vector.shape_cast %65 : vector<1x24x32xf32> to vector<24x32xf32>
    %67 = vector.shape_cast %64 : vector<24x32xf32> to vector<1x24x32xf32>
    tpu.vector_store %arg6[%c0_24, %c0_25, %c0_26], %67 {strides = array<i32>} : memref<1x24x32xf32, #tpu.memory_space<vmem>>, vector<1x24x32xf32>,
    return
  }
  func.func @transform_0(%arg0: i32) -> (i32, i32, i32) {
    %c0_i32 = arith.constant 0 : i32
    %c0_i32_0 = arith.constant 0 : i32
    %c0_i32_1 = arith.constant 0 : i32
    return %arg0, %c0_i32, %c0_i32_0 : i32, i32, i32
  }
  func.func @transform_1(%arg0: i32) -> (i32, i32, i32) {
    %c0_i32 = arith.constant 0 : i32
    %c0_i32_0 = arith.constant 0 : i32
    %c0_i32_1 = arith.constant 0 : i32
    return %arg0, %c0_i32, %c0_i32_0 : i32, i32, i32
  }
  func.func @transform_2(%arg0: i32) -> (i32, i32) {
    %c0_i32 = arith.constant 0 : i32
    %c0_i32_0 = arith.constant 0 : i32
    %c0_i32_1 = arith.constant 0 : i32
    return %c0_i32, %c0_i32_0 : i32, i32
  }
  func.func @transform_3(%arg0: i32) -> (i32, i32) {
    %c0_i32 = arith.constant 0 : i32
    %c0_i32_0 = arith.constant 0 : i32
    %c0_i32_1 = arith.constant 0 : i32
    return %c0_i32, %c0_i32_0 : i32, i32
  }
  func.func @transform_4(%arg0: i32) -> (i32, i32) {
    %c0_i32 = arith.constant 0 : i32
    %c0_i32_0 = arith.constant 0 : i32
    %c0_i32_1 = arith.constant 0 : i32
    return %c0_i32, %c0_i32_0 : i32, i32
  }
  func.func @transform_5(%arg0: i32) -> (i32, i32, i32) {
    %c0_i32 = arith.constant 0 : i32
    %c0_i32_0 = arith.constant 0 : i32
    %c0_i32_1 = arith.constant 0 : i32
    return %arg0, %c0_i32, %c0_i32_0 : i32, i32, i32
  }
}

module attributes {stable_mosaic.version = 11 : i64} {
  func.func @_mlp_block_kernel(%arg0: i32, %arg1: memref<16x32xf32, #tpu.memory_space<vmem>>, %arg2: memref<1x32xf32, #tpu.memory_space<vmem>>, %arg3: memref<1x32xf32, #tpu.memory_space<vmem>>, %arg4: memref<32x128xbf16, #tpu.memory_space<vmem>>, %arg5: memref<1x128xf32, #tpu.memory_space<vmem>>, %arg6: memref<128x32xbf16, #tpu.memory_space<vmem>>, %arg7: memref<1x32xf32, #tpu.memory_space<vmem>>, %arg8: memref<1x32xf32, #tpu.memory_space<vmem>>, %arg9: memref<16x32xf32, #tpu.memory_space<vmem>>) attributes {dimension_semantics = [#tpu.dimension_semantics<parallel>], iteration_bounds = array<i64: 3>, scalar_prefetch = 0 : i64, scratch_operands = 0 : i64, tpu.core_type = #tpu.core_type<tc>, window_params = [{transform_indices = @transform_0, window_bounds = array<i64: 16, 32>}, {pipeline_mode = #tpu.pipeline_mode<synchronous>, transform_indices = @transform_1, window_bounds = array<i64: 1, 32>}, {pipeline_mode = #tpu.pipeline_mode<synchronous>, transform_indices = @transform_2, window_bounds = array<i64: 1, 32>}, {pipeline_mode = #tpu.pipeline_mode<synchronous>, transform_indices = @transform_3, window_bounds = array<i64: 32, 128>}, {pipeline_mode = #tpu.pipeline_mode<synchronous>, transform_indices = @transform_4, window_bounds = array<i64: 1, 128>}, {pipeline_mode = #tpu.pipeline_mode<synchronous>, transform_indices = @transform_5, window_bounds = array<i64: 128, 32>}, {pipeline_mode = #tpu.pipeline_mode<synchronous>, transform_indices = @transform_6, window_bounds = array<i64: 1, 32>}, {pipeline_mode = #tpu.pipeline_mode<synchronous>, transform_indices = @transform_7, window_bounds = array<i64: 1, 32>}, {transform_indices = @transform_8, window_bounds = array<i64: 16, 32>}]} {
    %c0 = arith.constant 0 : index
    %c0_0 = arith.constant 0 : index
    %0 = vector.load %arg1[%c0, %c0_0] : memref<16x32xf32, #tpu.memory_space<vmem>>, vector<16x32xf32>
    %cst = arith.constant dense<0.000000e+00> : vector<16xf32>
    %1 = vector.multi_reduction <add>, %0, %cst [1] : vector<16x32xf32> to vector<16xf32>
    %2 = vector.shape_cast %1 : vector<16xf32> to vector<16x1xf32>
    %cst_1 = arith.constant 3.200000e+01 : f32
    %3 = vector.broadcast %cst_1 : f32 to vector<16x1xf32>
    %4 = arith.divf %2, %3 : vector<16x1xf32>
    %5 = vector.broadcast %4 : vector<16x1xf32> to vector<16x32xf32>
    %6 = arith.subf %0, %5 : vector<16x32xf32>
    %7 = arith.mulf %6, %6 : vector<16x32xf32>
    %cst_2 = arith.constant dense<0.000000e+00> : vector<16xf32>
    %8 = vector.multi_reduction <add>, %7, %cst_2 [1] : vector<16x32xf32> to vector<16xf32>
    %9 = vector.shape_cast %8 : vector<16xf32> to vector<16x1xf32>
    %cst_3 = arith.constant 3.200000e+01 : f32
    %10 = vector.broadcast %cst_3 : f32 to vector<16x1xf32>
    %11 = arith.divf %9, %10 : vector<16x1xf32>
    %12 = vector.broadcast %4 : vector<16x1xf32> to vector<16x32xf32>
    %13 = arith.subf %0, %12 : vector<16x32xf32>
    %cst_4 = arith.constant 9.99999997E-7 : f32
    %14 = vector.broadcast %cst_4 : f32 to vector<16x1xf32>
    %15 = arith.addf %11, %14 : vector<16x1xf32>
    %16 = math.rsqrt %15 : vector<16x1xf32>
    %17 = vector.broadcast %16 : vector<16x1xf32> to vector<16x32xf32>
    %18 = arith.mulf %13, %17 : vector<16x32xf32>
    %c0_5 = arith.constant 0 : index
    %c0_6 = arith.constant 0 : index
    %19 = vector.load %arg2[%c0_5, %c0_6] : memref<1x32xf32, #tpu.memory_space<vmem>>, vector<1x32xf32>
    %20 = vector.broadcast %19 : vector<1x32xf32> to vector<16x32xf32>
    %21 = arith.mulf %18, %20 : vector<16x32xf32>
    %c0_7 = arith.constant 0 : index
    %c0_8 = arith.constant 0 : index
    %22 = vector.load %arg3[%c0_7, %c0_8] : memref<1x32xf32, #tpu.memory_space<vmem>>, vector<1x32xf32>
    %23 = vector.broadcast %22 : vector<1x32xf32> to vector<16x32xf32>
    %24 = arith.addf %21, %23 : vector<16x32xf32>
    %25 = arith.truncf %24 : vector<16x32xf32> to vector<16x32xbf16>
    %c0_9 = arith.constant 0 : index
    %c0_10 = arith.constant 0 : index
    %26 = vector.load %arg4[%c0_9, %c0_10] : memref<32x128xbf16, #tpu.memory_space<vmem>>, vector<32x128xbf16>
    %cst_11 = arith.constant dense<0.000000e+00> : vector<16x128xf32>
    %27 = tpu.matmul %25, %26, %cst_11 {dimension_numbers = #tpu.dot_dimension_numbers<[1], [0], [0], [1], [0, 0, 1, 1], [], []>} : vector<16x32xbf16>, vector<32x128xbf16>, vector<16x128xf32> -> vector<16x128xf32>
    %c0_12 = arith.constant 0 : index
    %c0_13 = arith.constant 0 : index
    %28 = vector.load %arg5[%c0_12, %c0_13] : memref<1x128xf32, #tpu.memory_space<vmem>>, vector<1x128xf32>
    %29 = vector.broadcast %28 : vector<1x128xf32> to vector<16x128xf32>
    %30 = arith.addf %27, %29 : vector<16x128xf32>
    %31 = arith.mulf %30, %30 : vector<16x128xf32>
    %32 = arith.mulf %30, %31 : vector<16x128xf32>
    %cst_14 = arith.constant 4.471500e-02 : f32
    %33 = vector.broadcast %cst_14 : f32 to vector<16x128xf32>
    %34 = arith.mulf %33, %32 : vector<16x128xf32>
    %35 = arith.addf %30, %34 : vector<16x128xf32>
    %cst_15 = arith.constant 0.797884583 : f32
    %36 = vector.broadcast %cst_15 : f32 to vector<16x128xf32>
    %37 = arith.mulf %36, %35 : vector<16x128xf32>
    %38 = math.tanh %37 : vector<16x128xf32>
    %cst_16 = arith.constant 1.000000e+00 : f32
    %39 = vector.broadcast %cst_16 : f32 to vector<16x128xf32>
    %40 = arith.addf %39, %38 : vector<16x128xf32>
    %cst_17 = arith.constant 5.000000e-01 : f32
    %41 = vector.broadcast %cst_17 : f32 to vector<16x128xf32>
    %42 = arith.mulf %41, %40 : vector<16x128xf32>
    %43 = arith.mulf %30, %42 : vector<16x128xf32>
    %44 = arith.truncf %43 : vector<16x128xf32> to vector<16x128xbf16>
    %c0_18 = arith.constant 0 : index
    %c0_19 = arith.constant 0 : index
    %45 = vector.load %arg6[%c0_18, %c0_19] : memref<128x32xbf16, #tpu.memory_space<vmem>>, vector<128x32xbf16>
    %cst_20 = arith.constant dense<0.000000e+00> : vector<16x32xf32>
    %46 = tpu.matmul %44, %45, %cst_20 {dimension_numbers = #tpu.dot_dimension_numbers<[1], [0], [0], [1], [0, 0, 1, 1], [], []>} : vector<16x128xbf16>, vector<128x32xbf16>, vector<16x32xf32> -> vector<16x32xf32>
    %c0_21 = arith.constant 0 : index
    %c0_22 = arith.constant 0 : index
    %47 = vector.load %arg7[%c0_21, %c0_22] : memref<1x32xf32, #tpu.memory_space<vmem>>, vector<1x32xf32>
    %48 = vector.broadcast %47 : vector<1x32xf32> to vector<16x32xf32>
    %49 = arith.addf %46, %48 : vector<16x32xf32>
    %c0_23 = arith.constant 0 : index
    %c0_24 = arith.constant 0 : index
    %50 = vector.load %arg8[%c0_23, %c0_24] : memref<1x32xf32, #tpu.memory_space<vmem>>, vector<1x32xf32>
    %51 = vector.broadcast %50 : vector<1x32xf32> to vector<16x32xf32>
    %52 = arith.mulf %49, %51 : vector<16x32xf32>
    %53 = arith.addf %0, %52 : vector<16x32xf32>
    %c0_25 = arith.constant 0 : index
    %c0_26 = arith.constant 0 : index
    %54 = vector.load %arg9[%c0_25, %c0_26] : memref<16x32xf32, #tpu.memory_space<vmem>>, vector<16x32xf32>
    tpu.vector_store %arg9[%c0_25, %c0_26], %53 {strides = array<i32>} : memref<16x32xf32, #tpu.memory_space<vmem>>, vector<16x32xf32>,
    return
  }
  func.func @transform_0(%arg0: i32) -> (i32, i32) {
    %c0_i32 = arith.constant 0 : i32
    %c0_i32_0 = arith.constant 0 : i32
    return %arg0, %c0_i32 : i32, i32
  }
  func.func @transform_1(%arg0: i32) -> (i32, i32) {
    %c0_i32 = arith.constant 0 : i32
    %c0_i32_0 = arith.constant 0 : i32
    %c0_i32_1 = arith.constant 0 : i32
    return %c0_i32, %c0_i32_0 : i32, i32
  }
  func.func @transform_2(%arg0: i32) -> (i32, i32) {
    %c0_i32 = arith.constant 0 : i32
    %c0_i32_0 = arith.constant 0 : i32
    %c0_i32_1 = arith.constant 0 : i32
    return %c0_i32, %c0_i32_0 : i32, i32
  }
  func.func @transform_3(%arg0: i32) -> (i32, i32) {
    %c0_i32 = arith.constant 0 : i32
    %c0_i32_0 = arith.constant 0 : i32
    %c0_i32_1 = arith.constant 0 : i32
    return %c0_i32, %c0_i32_0 : i32, i32
  }
  func.func @transform_4(%arg0: i32) -> (i32, i32) {
    %c0_i32 = arith.constant 0 : i32
    %c0_i32_0 = arith.constant 0 : i32
    %c0_i32_1 = arith.constant 0 : i32
    return %c0_i32, %c0_i32_0 : i32, i32
  }
  func.func @transform_5(%arg0: i32) -> (i32, i32) {
    %c0_i32 = arith.constant 0 : i32
    %c0_i32_0 = arith.constant 0 : i32
    %c0_i32_1 = arith.constant 0 : i32
    return %c0_i32, %c0_i32_0 : i32, i32
  }
  func.func @transform_6(%arg0: i32) -> (i32, i32) {
    %c0_i32 = arith.constant 0 : i32
    %c0_i32_0 = arith.constant 0 : i32
    %c0_i32_1 = arith.constant 0 : i32
    return %c0_i32, %c0_i32_0 : i32, i32
  }
  func.func @transform_7(%arg0: i32) -> (i32, i32) {
    %c0_i32 = arith.constant 0 : i32
    %c0_i32_0 = arith.constant 0 : i32
    %c0_i32_1 = arith.constant 0 : i32
    return %c0_i32, %c0_i32_0 : i32, i32
  }
  func.func @transform_8(%arg0: i32) -> (i32, i32) {
    %c0_i32 = arith.constant 0 : i32
    %c0_i32_0 = arith.constant 0 : i32
    return %arg0, %c0_i32 : i32, i32
  }
}

module attributes {stable_mosaic.version = 11 : i64} {
  func.func @_head_softmax_kernel(%arg0: i32, %arg1: memref<2x32xf32, #tpu.memory_space<vmem>>, %arg2: memref<1x32xf32, #tpu.memory_space<vmem>>, %arg3: memref<1x32xf32, #tpu.memory_space<vmem>>, %arg4: memref<32x8xbf16, #tpu.memory_space<vmem>>, %arg5: memref<1x8xf32, #tpu.memory_space<vmem>>, %arg6: memref<2x8xf32, #tpu.memory_space<vmem>>) attributes {dimension_semantics = [#tpu.dimension_semantics<arbitrary>], iteration_bounds = array<i64: 1>, scalar_prefetch = 0 : i64, scratch_operands = 0 : i64, tpu.core_type = #tpu.core_type<tc>, window_params = [{pipeline_mode = #tpu.pipeline_mode<synchronous>, transform_indices = @transform_0, window_bounds = array<i64: 2, 32>}, {pipeline_mode = #tpu.pipeline_mode<synchronous>, transform_indices = @transform_1, window_bounds = array<i64: 1, 32>}, {pipeline_mode = #tpu.pipeline_mode<synchronous>, transform_indices = @transform_2, window_bounds = array<i64: 1, 32>}, {pipeline_mode = #tpu.pipeline_mode<synchronous>, transform_indices = @transform_3, window_bounds = array<i64: 32, 8>}, {pipeline_mode = #tpu.pipeline_mode<synchronous>, transform_indices = @transform_4, window_bounds = array<i64: 1, 8>}, {pipeline_mode = #tpu.pipeline_mode<synchronous>, transform_indices = @transform_5, window_bounds = array<i64: 2, 8>}]} {
    %c0 = arith.constant 0 : index
    %c0_0 = arith.constant 0 : index
    %0 = vector.load %arg1[%c0, %c0_0] : memref<2x32xf32, #tpu.memory_space<vmem>>, vector<2x32xf32>
    %cst = arith.constant dense<0.000000e+00> : vector<2xf32>
    %1 = vector.multi_reduction <add>, %0, %cst [1] : vector<2x32xf32> to vector<2xf32>
    %2 = vector.shape_cast %1 : vector<2xf32> to vector<2x1xf32>
    %cst_1 = arith.constant 3.200000e+01 : f32
    %3 = vector.broadcast %cst_1 : f32 to vector<2x1xf32>
    %4 = arith.divf %2, %3 : vector<2x1xf32>
    %5 = vector.broadcast %4 : vector<2x1xf32> to vector<2x32xf32>
    %6 = arith.subf %0, %5 : vector<2x32xf32>
    %7 = arith.mulf %6, %6 : vector<2x32xf32>
    %cst_2 = arith.constant dense<0.000000e+00> : vector<2xf32>
    %8 = vector.multi_reduction <add>, %7, %cst_2 [1] : vector<2x32xf32> to vector<2xf32>
    %9 = vector.shape_cast %8 : vector<2xf32> to vector<2x1xf32>
    %cst_3 = arith.constant 3.200000e+01 : f32
    %10 = vector.broadcast %cst_3 : f32 to vector<2x1xf32>
    %11 = arith.divf %9, %10 : vector<2x1xf32>
    %12 = vector.broadcast %4 : vector<2x1xf32> to vector<2x32xf32>
    %13 = arith.subf %0, %12 : vector<2x32xf32>
    %cst_4 = arith.constant 9.99999997E-7 : f32
    %14 = vector.broadcast %cst_4 : f32 to vector<2x1xf32>
    %15 = arith.addf %11, %14 : vector<2x1xf32>
    %16 = math.rsqrt %15 : vector<2x1xf32>
    %17 = vector.broadcast %16 : vector<2x1xf32> to vector<2x32xf32>
    %18 = arith.mulf %13, %17 : vector<2x32xf32>
    %c0_5 = arith.constant 0 : index
    %c0_6 = arith.constant 0 : index
    %19 = vector.load %arg2[%c0_5, %c0_6] : memref<1x32xf32, #tpu.memory_space<vmem>>, vector<1x32xf32>
    %20 = vector.broadcast %19 : vector<1x32xf32> to vector<2x32xf32>
    %21 = arith.mulf %18, %20 : vector<2x32xf32>
    %c0_7 = arith.constant 0 : index
    %c0_8 = arith.constant 0 : index
    %22 = vector.load %arg3[%c0_7, %c0_8] : memref<1x32xf32, #tpu.memory_space<vmem>>, vector<1x32xf32>
    %23 = vector.broadcast %22 : vector<1x32xf32> to vector<2x32xf32>
    %24 = arith.addf %21, %23 : vector<2x32xf32>
    %25 = arith.truncf %24 : vector<2x32xf32> to vector<2x32xbf16>
    %c0_9 = arith.constant 0 : index
    %c0_10 = arith.constant 0 : index
    %26 = vector.load %arg4[%c0_9, %c0_10] : memref<32x8xbf16, #tpu.memory_space<vmem>>, vector<32x8xbf16>
    %cst_11 = arith.constant dense<0.000000e+00> : vector<2x8xf32>
    %27 = tpu.matmul %25, %26, %cst_11 {dimension_numbers = #tpu.dot_dimension_numbers<[1], [0], [0], [1], [0, 0, 1, 1], [], []>} : vector<2x32xbf16>, vector<32x8xbf16>, vector<2x8xf32> -> vector<2x8xf32>
    %c0_12 = arith.constant 0 : index
    %c0_13 = arith.constant 0 : index
    %28 = vector.load %arg5[%c0_12, %c0_13] : memref<1x8xf32, #tpu.memory_space<vmem>>, vector<1x8xf32>
    %29 = vector.broadcast %28 : vector<1x8xf32> to vector<2x8xf32>
    %30 = arith.addf %27, %29 : vector<2x8xf32>
    %cst_14 = arith.constant dense<0xFF800000> : vector<2xf32>
    %31 = vector.multi_reduction <maximumf>, %30, %cst_14 [1] : vector<2x8xf32> to vector<2xf32>
    %32 = vector.shape_cast %31 : vector<2xf32> to vector<2x1xf32>
    %33 = vector.broadcast %32 : vector<2x1xf32> to vector<2x8xf32>
    %34 = arith.subf %30, %33 : vector<2x8xf32>
    %35 = math.exp %34 : vector<2x8xf32>
    %cst_15 = arith.constant dense<0.000000e+00> : vector<2xf32>
    %36 = vector.multi_reduction <add>, %35, %cst_15 [1] : vector<2x8xf32> to vector<2xf32>
    %37 = vector.shape_cast %36 : vector<2xf32> to vector<2x1xf32>
    %38 = vector.broadcast %37 : vector<2x1xf32> to vector<2x8xf32>
    %39 = arith.divf %35, %38 : vector<2x8xf32>
    %c0_16 = arith.constant 0 : index
    %c0_17 = arith.constant 0 : index
    %40 = vector.load %arg6[%c0_16, %c0_17] : memref<2x8xf32, #tpu.memory_space<vmem>>, vector<2x8xf32>
    tpu.vector_store %arg6[%c0_16, %c0_17], %39 {strides = array<i32>} : memref<2x8xf32, #tpu.memory_space<vmem>>, vector<2x8xf32>,
    return
  }
  func.func @transform_0(%arg0: i32) -> (i32, i32) {
    %c0_i32 = arith.constant 0 : i32
    %c0_i32_0 = arith.constant 0 : i32
    %c0_i32_1 = arith.constant 0 : i32
    return %c0_i32, %c0_i32_0 : i32, i32
  }
  func.func @transform_1(%arg0: i32) -> (i32, i32) {
    %c0_i32 = arith.constant 0 : i32
    %c0_i32_0 = arith.constant 0 : i32
    %c0_i32_1 = arith.constant 0 : i32
    return %c0_i32, %c0_i32_0 : i32, i32
  }
  func.func @transform_2(%arg0: i32) -> (i32, i32) {
    %c0_i32 = arith.constant 0 : i32
    %c0_i32_0 = arith.constant 0 : i32
    %c0_i32_1 = arith.constant 0 : i32
    return %c0_i32, %c0_i32_0 : i32, i32
  }
  func.func @transform_3(%arg0: i32) -> (i32, i32) {
    %c0_i32 = arith.constant 0 : i32
    %c0_i32_0 = arith.constant 0 : i32
    %c0_i32_1 = arith.constant 0 : i32
    return %c0_i32, %c0_i32_0 : i32, i32
  }
  func.func @transform_4(%arg0: i32) -> (i32, i32) {
    %c0_i32 = arith.constant 0 : i32
    %c0_i32_0 = arith.constant 0 : i32
    %c0_i32_1 = arith.constant 0 : i32
    return %c0_i32, %c0_i32_0 : i32, i32
  }
  func.func @transform_5(%arg0: i32) -> (i32, i32) {
    %c0_i32 = arith.constant 0 : i32
    %c0_i32_0 = arith.constant 0 : i32
    %c0_i32_1 = arith.constant 0 : i32
    return %c0_i32, %c0_i32_0 : i32, i32
  }
}

</mosaic_0001>

<bundles_post_ra>
// kernel: dino_v2_forward.9
= control target key start
LH: loop header
LB: loop body
LE: loop exit
PB: predicated region body
PF: predicated region fallthrough
CT: control target
= control target key end

     0   :  { %s500_s18 = smov 0   ;;  %s541_s0 = inlined_call_operand.vmem [shape: f32[48,32], index: 0, kind: input, shape index: {}]   ;;  %s542_s1 = inlined_call_operand.vmem [shape: f32[1,32], index: 1, kind: input, shape index: {}]   ;;  %s543_s2 = inlined_call_operand.vmem [shape: f32[1,32], index: 2, kind: input, shape index: {}]   ;;  %s544_s3 = inlined_call_operand.vmem [shape: bf16[32,96], index: 3, kind: input, shape index: {}]   ;;  %s545_s4 = inlined_call_operand.vmem [shape: f32[1,96], index: 4, kind: input, shape index: {}]   ;;  %s546_s5 = inlined_call_operand.vmem [shape: bf16[48,96], index: 5, kind: output, shape index: {}]  }
   0x1 LB: > { %s412_s19 = sadd.s32 4294967295, %s466_s18   ;;  %p416_p0 = scmp.ge.s32.totalorder %s466_s18, 1  ;;  %s466_s18 = sphi %s500_s18, %s15_s18  }
   0x2   : > { %p188_p1 = scmp.lt.s32.totalorder %s466_s18, 4 }
   0x4   : > { %p189_p2 = pnand %p416_p0, %p188_p1 }
   0x5   : > { %s417_s20 = sshll.u32 (!%p189_p2), %s412_s19, 1  ;;  %vm231_vm0 = vcmask (!%p189_p2), 261120   ;;  %v454_v14 = vld [vmem:[%s544_s3] sm:$0xff] (!%p189_p2)   ;;  %v468_v15 = vmov (!%p189_p2), 0.0   ;;  %v455_v16 = vld [vmem:[%s544_s3 + $0x8] sm:$0xff] (!%p189_p2)   ;;  %vm469_vm1 = vmmov (!%p189_p2), 0  }
   0x6   : > { %192 = sbr.rel (%p189_p2) target bundleno = 555 (0x22b), region = 40  ;;  %p217_p3 = scmp.lt.s32.totalorder (!%p189_p2), %s417_s20, 5  ;;  %436 = vmatprep.subr.bf16.mxu0 (!%p189_p2), %v468_v15  ;;  %440 = vmatprep.mubr.msk.bf16.mxu0 (!%p189_p2), %vm469_vm1, %v468_v15  ;;  %v421_v25 = vld [vmem:[%s542_s1] ss:$0 sm:$0xff] (!%p189_p2)  ;;  %vm353_vm2 = vcmask (!%p189_p2), 781312  }
   0x7   : > { %437 = vmatpush3.bf16.msra.mxu0 (!%p189_p2), %v454_v14  ;;  %v422_v29 = vld [vmem:[%s543_s2] ss:$0 sm:$0xff] (!%p189_p2) }
   0x8   : > { %438 = vmatprep.subr.bf16.mxu0 (!%p189_p2), %v468_v15  ;;  %v423_v34 = vld [vmem:[%s545_s4] ss:$0 sm:$0xff] (!%p189_p2) }
   0xb   : > { %439 = vmatpush3.bf16.msra.mxu0 (!%p189_p2), %v455_v16 }
   0xd   : > { %s548_s20 = smov (!%p217_p3, %s417_s20), 5 }
   0xe   : > { %s418_s21 = sshll.u32 %s548_s20, 3  ;;  %s420_s10 = sshll.u32 %s548_s20, 2 }
   0xf   : > { %s220_s24 = scalar_lea.vmem %s541_s0, %s418_s21  ;;  %s226_s13 = scalar_lea.vmem %s546_s5, %s420_s10 }
  0x10   : > { %v229_v0 = vld [vmem:[%s220_s24] sm:$0xff]  ;;  %v230_v1 = vld [vmem:[%s220_s24 + $0x8] sm:$0xff] }
  0x11   : > { %v232_v2 = vsel %vm231_vm0, %v229_v0, 0.0  ;;  %v235_v3 = vsel %vm231_vm0, %v230_v1, 0.0 }
  0x12   : > { %233 = vadd.xlane.f32.xlu0 %v232_v2 }
  0x16   : > { %236 = vadd.xlane.f32.xlu0 %v235_v3 }
  0x9f   : > { %v234_v4 = vpop.xlane.xlu0 %233 }
  0xa0   : > { %v239_v5 = vmul.f32 0.03125, %v234_v4 }
  0xa2   : > { %v241_v6 = vsub.f32 %v229_v0, %v239_v5 }
  0xa3   : > { %v237_v7 = vpop.xlane.xlu0 %236 }
  0xa4   : > { %v240_v8 = vmul.f32 0.03125, %v237_v7  ;;  %v243_v9 = vmul.f32 %v241_v6, %v241_v6 }
  0xa6   : > { %v242_v10 = vsub.f32 %v230_v1, %v240_v8  ;;  %v245_v11 = vsel %vm231_vm0, %v243_v9, 0.0 }
  0xa7   : > { %246 = vadd.xlane.f32.xlu1 %v245_v11 }
  0xa8   : > { %v244_v12 = vmul.f32 %v242_v10, %v242_v10 }
  0xaa   : > { %v248_v13 = vsel %vm231_vm0, %v244_v12, 0.0 }
  0xab   : > { %249 = vadd.xlane.f32.xlu1 %v248_v13 }
 0x134   : > { %v247_v17 = vpop.xlane.xlu1 %246 }
 0x135   : > { %v251_v18 = vmul.f32 0.03125, %v247_v17 }
 0x137   : > { %v253_v19 = vadd.f32 1e-06, %v251_v18 }
 0x138   : > { %v250_v20 = vpop.xlane.xlu1 %249 }
 0x139   : > { %456 = vrsqrt.f32 %v253_v19  ;;  %v252_v21 = vmul.f32 0.03125, %v250_v20 }
 0x13b   : > { %v254_v22 = vadd.f32 1e-06, %v252_v21 }
 0x13d   : > { %458 = vrsqrt.f32 %v254_v22 }
 0x143   : > { %v457_v23 = vpop.eup %456 }
 0x144   : > { %v257_v24 = vmul.f32 %v457_v23, %v241_v6 }
 0x146   : > { %v266_v28 = vmul.f32 %v421_v25, %v257_v24 }
 0x147   : > { %v459_v26 = vpop.eup %458 }
 0x148   : > { %v258_v27 = vmul.f32 %v459_v26, %v242_v10  ;;  %v275_v31 = vadd.f32 %v422_v29, %v266_v28 }
 0x14a   : > { %v267_v30 = vmul.f32 %v421_v25, %v258_v27 }
 0x14c   : > { %v276_v32 = vadd.f32 %v422_v29, %v267_v30 }
 0x14e   : > { %v277_v33 = vpack.c.bf16 %v276_v32, %v275_v31 }
 0x150   : > { %441 = vmatmul.mubr.msk.bf16.vlgmr.msra.gmra.mrb[0].mxu0 %vm231_vm0, %v277_v33 }
 0x223   : > { %v338_v35 = vpop.f32.mrb[0].mxu0 }
 0x224   : > { %v339_v36 = vadd.f32 %v423_v34, %v338_v35  ;;  %v442_v37 = vpop.f32.mrb[1].mxu0 }
 0x225   : > { %v341_v38 = vpop.f32.mrb[2].mxu0 }
 0x226   : > { %v431_v39 = vpack.c.bf16 %v339_v36, %v339_v36  ;;  %v342_v40 = vadd.f32 %v423_v34, %v341_v38  ;;  %v443_v41 = vpop.f32.mrb[3].mxu0 }
 0x228   : > { %354 = vst.msk [vmem:[%s226_s13] sm:$0xf] %vm353_vm2, %v431_v39  ;;  %v432_v42 = vpack.c.bf16 %v342_v40, %v342_v40 }
 0x22a   : > { %355 = vst.msk [vmem:[%s226_s13 + $0x4] sm:$0xf] %vm353_vm2, %v432_v42 }
 0x22b PF: > { %s15_s18 = sadd.s32 1, %s466_s18  }
 0x22c   : > { %p12_p4 = scmp.ge.s32.totalorder %s15_s18, 5  }
 0x22e   :  { %14 = sbr.rel (!%p12_p4) target bundleno = 1 (0x1), region = 70 }

// kernel: dino_v2_forward.8
= control target key start
LH: loop header
LB: loop body
LE: loop exit
PB: predicated region body
PF: predicated region fallthrough
CT: control target
= control target key end

     0   :  { %vm52_vm0 = vcmask 392192   ;;  %vm108_vm1 = vcmask 261120   ;;  %s197_s1 = inlined_call_operand.vmem [shape: bf16[48,32], index: 1, kind: input, shape index: {}]   ;;  %s198_s0 = inlined_call_operand.vmem [shape: f32[32,48], index: 0, kind: input, shape index: {}]   ;;  %s199_s2 = inlined_call_operand.vmem [shape: f32[1,32], index: 2, kind: input, shape index: {}]   ;;  %s200_s3 = inlined_call_operand.vmem [shape: f32[32,32], index: 3, kind: output, shape index: {}]  }
   0x1   :  { %v138_v0 = vld [vmem:[%s197_s1] sm:$0xff]   ;;  %v139_v1 = vld [vmem:[%s197_s1 + $0x8] sm:$0xff]   ;;  %v140_v4 = vld [vmem:[%s197_s1 + $0x10] sm:$0xff]  }
   0x2   :  { %128 = vmatprep.subr.bf16.mxu0 %v138_v0  ;;  %v15_v2 = vld [vmem:[%s198_s0] sm:$0xff]  ;;  %v16_v3 = vld [vmem:[%s198_s0 + $0x8] sm:$0xff]  ;;  %v17_v6 = vld [vmem:[%s198_s0 + $0x10] sm:$0xff] }
   0x3   :  { %129 = vmatpush3.bf16.msra.mxu0 %v138_v0  ;;  %v19_v5 = vpack.c.bf16 %v16_v3, %v15_v2  ;;  %v18_v7 = vld [vmem:[%s198_s0 + $0x18] sm:$0xff]  ;;  %v117_v9 = vld [vmem:[%s199_s2] ss:$0 sm:$0xff] }
   0x4   :  { %130 = vmatprep.subr.bf16.mxu0 %v139_v1  ;;  %v20_v8 = vpack.c.bf16 %v18_v7, %v17_v6 }
   0x5   :  { %134 = vmatprep.mubr.msk.bf16.mxu0 %vm52_vm0, %v19_v5 }
   0x7   :  { %131 = vmatpush3.bf16.msra.mxu0 %v139_v1 }
   0x8   :  { %132 = vmatprep.subr.bf16.mxu0 %v140_v4 }
   0xb   :  { %133 = vmatpush3.bf16.msra.mxu0 %v140_v4 }
   0xe   :  { %135 = vmatmul.mubr.msk.bf16.vlgmr.msra.gmra.mrb[0].mxu0 %vm52_vm0, %v20_v8 }
  0xe1   :  { %v136_v10 = vpop.f32.mrb[0].mxu0 }
  0xe2   :  { %v102_v11 = vadd.f32 %v136_v10, %v117_v9  ;;  %v93_v12 = vpop.f32.mrb[1].mxu0 }
  0xe3   :  { %v94_v13 = vadd.f32 %v117_v9, %v93_v12  ;;  %v137_v14 = vpop.f32.mrb[2].mxu0 }
  0xe4   :  { %111 = vst.msk [vmem:[%s200_s3 + $0x10] sm:$0xff] %vm108_vm1, %v102_v11  ;;  %v105_v15 = vadd.f32 %v137_v14, %v117_v9  ;;  %v96_v16 = vpop.f32.mrb[3].mxu0 }
  0xe5   :  { %109 = vst.msk [vmem:[%s200_s3] sm:$0xff] %vm108_vm1, %v94_v13  ;;  %v97_v17 = vadd.f32 %v117_v9, %v96_v16 }
  0xe6   :  { %112 = vst.msk [vmem:[%s200_s3 + $0x18] sm:$0xff] %vm108_vm1, %v105_v15 }
  0xe7   :  { %110 = vst.msk [vmem:[%s200_s3 + $0x8] sm:$0xff] %vm108_vm1, %v97_v17 }

// kernel: dino_v2_forward.10
= control target key start
LH: loop header
LB: loop body
LE: loop exit
PB: predicated region body
PF: predicated region fallthrough
CT: control target
= control target key end

     0   :  { %s972_s18 = smov 0   ;;  %s1090_s0 = inlined_call_operand.vmem [shape: bf16[2,24,96], index: 0, kind: input, shape index: {}]   ;;  %s1091_s1 = inlined_call_operand.vmem [shape: f32[2,24,32], index: 1, kind: input, shape index: {}, may-alias: {1,5}]   ;;  %s1092_s2 = inlined_call_operand.vmem [shape: bf16[32,32], index: 2, kind: input, shape index: {}]   ;;  %s1093_s3 = inlined_call_operand.vmem [shape: f32[1,32], index: 3, kind: input, shape index: {}]   ;;  %s1094_s4 = inlined_call_operand.vmem [shape: f32[1,32], index: 4, kind: input, shape index: {}]   ;;  %s1095_s5 = inlined_call_operand.vmem [shape: f32[2,24,32], index: 5, kind: output, shape index: {}, may-alias: {1,5}]  }
   0x1 LB: > { %s786_s19 = sadd.s32 4294967295, %s934_s18   ;;  %p790_p0 = scmp.ge.s32.totalorder %s934_s18, 1  ;;  %s934_s18 = sphi %s972_s18, %s15_s18  }
   0x2   : > { %p197_p1 = scmp.lt.s32.totalorder %s934_s18, 3 }
   0x4   : > { %p198_p2 = pnand %p790_p0, %p197_p1 }
   0x5   : > { %p230_p3 = scmp.lt.s32.totalorder (!%p198_p2), %s786_s19, 1  ;;  %s936_s24 = smov (!%p198_p2), 96   ;;  %vm272_vm0 = vcmask (!%p198_p2), 130048   ;;  %v333_v15 = vlaneseq (!%p198_p2)  ;;  %vm339_vm2 = vcmask (!%p198_p2), 195584   ;;  %vm386_vm3 = vcmask (!%p198_p2), 1043456  }
   0x6   : > { %201 = sbr.rel (%p198_p2) target bundleno = 1803 (0x70b), region = 40  ;;  %s937_s25 = smov (!%p198_p2), 64   ;;  %vm648_vm4 = vcmask (!%p198_p2), 261120  }
   0x7   : > { %v1003_v16 = vand.u32 (!%p198_p2), 127, %v333_v15  ;;  %s938_s26 = smov (!%p198_p2), 80   ;;  %s939_s27 = smov (!%p198_p2), 112  }
   0x8   : > { %s940_s28 = smov (!%p198_p2), 48   ;;  %s941_s8 = smov (!%p198_p2), 16  }
   0x9   : > { %vm335_vm1 = vcmp.lt.s32.totalorder (!%p198_p2), %v1003_v16, 21 }
   0xd   : > { %s1097_s19 = smov (!%p230_p3, %s786_s19), 1 }
   0xe   : > { %s878_s20 = smul.u32 12, %s1097_s19 }
   0xf   : > { %s879_s9 = smul.u32 24, %s1097_s19 }
  0x10   : > { %s234_s23 = scalar_lea.vmem %s1090_s0, %s878_s20 }
  0x11   : > { %v986_v0 = vld [vmem:[%s234_s23] sm:$0xff]   ;;  %v248_v1 = vld [vmem:[%s234_s23 + $0x8] sm:$0xf]  ;;  %s239_s14 = scalar_lea.vmem %s1091_s1, %s879_s9  ;;  %s244_s20 = scalar_lea.vmem %s1095_s5, %s879_s9 }
  0x12   : > { %v252_v2 = vunpack.c.l.bf16 %v986_v0  ;;  %v253_v3 = vunpack.c.h.bf16 %v986_v0  ;;  %268 = vrot.lane.b32.xlu0 %v986_v0, %s936_s24  ;;  %v991_v4 = vcombine.low %v248_v1, %v248_v1  ;;  %v254_v11 = vunpack.c.l.bf16 %v248_v1 }
  0x14   : > { %v255_v5 = vmul.f32 0.25, %v252_v2  ;;  %v256_v6 = vmul.f32 0.25, %v253_v3  ;;  %v257_v13 = vmul.f32 0.25, %v254_v11 }
  0x16   : > { %v993_v7 = vpack.c.bf16 %v256_v6, %v255_v5  ;;  %270 = vrot.lane.b32.xlu0 %v991_v4, %s936_s24  ;;  %v259_v14 = vpack.c.bf16 %v257_v13, %v257_v13 }
  0x18   : > { %836 = vmatprep.mubr.msk.bf16.mxu0 %vm272_vm0, %v993_v7 }
  0x84   : > { %v269_v8 = vpop.permute.xlu0 %268 }
  0x85   : > { %872 = vmatprep.subr.msk.bf16.mxu0 %vm272_vm0, %v269_v8  ;;  %v280_v9 = vsel %vm272_vm0, %v269_v8, 0 }
  0x86   : > { %833 = vmatpush3.bf16.xpose.msra.mxu0 %v280_v9 }
  0x88   : > { %v271_v10 = vpop.permute.xlu0 %270 }
  0x89   : > { %873 = vmatprep.subr.msk.bf16.mxu0 %vm272_vm0, %v271_v10  ;;  %v283_v12 = vsel %vm272_vm0, %v271_v10, 0 }
  0x8e   : > { %835 = vmatpush3.bf16.xpose.msra.mxu0 %v283_v12 }
  0x95   : > { %837 = vmatmul.mubr.msk.bf16.vlgmr.msra.gmra.mrb[0].mxu0 %vm272_vm0, %v259_v14 }
 0x168   : > { %v838_v17 = vpop.f32.mrb[0].mxu0 }
 0x169   : > { %v338_v18 = vsel %vm335_vm1, %v838_v17, -1e+30  ;;  %v319_v19 = vpop.f32.mrb[1].mxu0 }
 0x16a   : > { %v336_v20 = vsel %vm335_vm1, %v319_v19, -1e+30  ;;  %v839_v21 = vpop.f32.mrb[2].mxu0  ;;  %v346_v22 = vsel %vm339_vm2, %v338_v18, -inf }
 0x16b   : > { %347 = vmax.xlane.f32.xlu0 %v346_v22  ;;  %v322_v23 = vpop.f32.mrb[3].mxu0  ;;  %v340_v24 = vsel %vm339_vm2, %v336_v20, -inf }
 0x16c   : > { %v337_v25 = vsel %vm335_vm1, %v322_v23, -1e+30  ;;  %341 = vmax.xlane.f32.xlu1 %v340_v24 }
 0x16d   : > { %v343_v26 = vsel %vm339_vm2, %v337_v25, -inf }
 0x170   : > { %344 = vmax.xlane.f32.xlu1 %v343_v26 }
 0x181   : > { %375 = vrot.lane.b32.xlu1 %v986_v0, %s937_s25  ;;  %444 = vrot.lane.b32.xlu0 %v986_v0, %s938_s26 }
 0x1f8   : > { %v348_v27 = vpop.xlane.xlu0 %347 }
 0x1f9   : > { %v351_v28 = vsub.f32 %v338_v18, %v348_v27  ;;  %v342_v29 = vpop.xlane.xlu1 %341 }
 0x1fa   : > { %v349_v30 = vsub.f32 %v336_v20, %v342_v29 }
 0x1fb   : > { %v356_v31 = vmul.f32 1.442695, %v351_v28 }
 0x1fc   : > { %v352_v32 = vmul.f32 1.442695, %v349_v30  ;;  %v445_v47 = vpop.permute.xlu0 %444 }
 0x1fd   : > { %904 = vpow2.f32 %v356_v31  ;;  %v345_v33 = vpop.xlane.xlu1 %344  ;;  %v455_v57 = vsel %vm272_vm0, %v445_v47, 0 }
 0x1fe   : > { %v350_v34 = vsub.f32 %v337_v25, %v345_v33  ;;  %906 = vpow2.f32 %v352_v32 }
 0x200   : > { %v354_v35 = vmul.f32 1.442695, %v350_v34 }
 0x201   : > { %v376_v36 = vpop.permute.xlu1 %375 }
 0x202   : > { %840 = vmatprep.subr.bf16.mxu1 %v376_v36  ;;  %908 = vpow2.f32 %v354_v35 }
 0x203   : > { %841 = vmatpush3.bf16.msra.mxu1 %v376_v36 }
 0x207   : > { %v905_v37 = vpop.eup %904 }
 0x208   : > { %v364_v38 = vsel %vm339_vm2, %v905_v37, 0.0  ;;  %v907_v39 = vpop.eup %906 }
 0x209   : > { %365 = vadd.xlane.f32.xlu1 %v364_v38  ;;  %v358_v40 = vsel %vm339_vm2, %v907_v39, 0.0 }
 0x20c   : > { %v909_v41 = vpop.eup %908 }
 0x20d   : > { %359 = vadd.xlane.f32.xlu1 %v358_v40  ;;  %v361_v42 = vsel %vm339_vm2, %v909_v41, 0.0 }
 0x211   : > { %362 = vadd.xlane.f32.xlu1 %v361_v42  ;;  %v902_v42 = vld [vmem:[%s1092_s2 + $0x8] sm:$0xff]  }
 0x222   : > { %377 = vrot.lane.b32.xlu1 %v991_v4, %s937_s25 }
 0x226   : > { %446 = vrot.lane.b32.xlu1 %v991_v4, %s938_s26 }
 0x22a   : > { %440 = vrot.lane.b32.xlu1 %v993_v7, %s939_s27 }
 0x22e   : > { %442 = vrot.lane.b32.xlu1 %v259_v14, %s939_s27 }
 0x296   : > { %v366_v43 = vpop.xlane.xlu1 %365 }
 0x297   : > { %910 = vrcp.f32 %v366_v43 }
 0x29a   : > { %v360_v44 = vpop.xlane.xlu1 %359 }
 0x29b   : > { %912 = vrcp.f32 %v360_v44 }
 0x29e   : > { %v363_v45 = vpop.xlane.xlu1 %362 }
 0x29f   : > { %914 = vrcp.f32 %v363_v45 }
 0x2a1   : > { %v911_v49 = vpop.eup %910 }
 0x2a2   : > { %v378_v46 = vpop.permute.xlu1 %377  ;;  %v372_v53 = vmul.f32 %v911_v49, %v905_v37 }
 0x2a3   : > { %874 = vmatprep.subr.msk.bf16.mxu1 %vm386_vm3, %v378_v46  ;;  %v388_v48 = vsel %vm386_vm3, %v378_v46, 0 }
 0x2a4   : > { %843 = vmatpush3.bf16.msra.mxu1 %v388_v48  ;;  %v374_v58 = vpack.c.bf16 %v372_v53, %v372_v53 }
 0x2a5   : > { %875 = vmatprep.subr.msk.bf16.mxu1 %vm272_vm0, %v445_v47  ;;  %v913_v50 = vpop.eup %912 }
 0x2a6   : > { %v447_v51 = vpop.permute.xlu1 %446  ;;  %v370_v54 = vmul.f32 %v913_v50, %v907_v39 }
 0x2a7   : > { %v458_v60 = vsel %vm272_vm0, %v447_v51, 0 }
 0x2a9   : > { %v915_v52 = vpop.eup %914 }
 0x2aa   : > { %v371_v55 = vmul.f32 %v915_v52, %v909_v41  ;;  %v441_v59 = vpop.permute.xlu1 %440  ;;  %v901_v41 = vld [vmem:[%s1092_s2] sm:$0xff]  }
 0x2ac   : > { %v373_v56 = vpack.c.bf16 %v371_v55, %v370_v54 }
 0x2ae   : > { %844 = vmatprep.mubr.msk.bf16.mxu1 %vm339_vm2, %v373_v56  ;;  %v443_v61 = vpop.permute.xlu1 %442 }
 0x2af   : > { %845 = vmatmul.mubr.msk.bf16.vlgmr.msra.gmra.mrb[0].mxu1 %vm339_vm2, %v374_v58 }
 0x2b0   : > { %849 = vmatpush3.bf16.xpose.msra.mxu1 %v455_v57  ;;  %852 = vmatprep.mubr.msk.bf16.mxu1 %vm272_vm0, %v441_v59  ;;  %v804_v57 = vld [vmem:[%s1093_s3] ss:$0 sm:$0xff] }
 0x2b1   : > { %876 = vmatprep.subr.msk.bf16.mxu1 %vm272_vm0, %v447_v51  ;;  %v809_v59 = vld [vmem:[%s1094_s4] ss:$0 sm:$0xff] }
 0x2b8   : > { %851 = vmatpush3.bf16.xpose.msra.mxu1 %v458_v60 }
 0x2bf   : > { %853 = vmatmul.mubr.msk.bf16.vlgmr.msra.gmra.mrb[4].mxu1 %vm272_vm0, %v443_v61 }
 0x382   : > { %v1033_v62 = vpop.f32.mrb[0].mxu1 }
 0x383   : > { %v1035_v63 = vpop.f32.mrb[1].mxu1 }
 0x384   : > { %v847_v1 = vpop.f32.mrb[2].mxu1 }
 0x385   : > { %v1037_v2 = vpop.f32.mrb[3].mxu1 }
 0x392   : > { %v854_v3 = vpop.f32.mrb[4].mxu1 }
 0x393   : > { %v494_v5 = vpop.f32.mrb[5].mxu1  ;;  %v510_v10 = vsel %vm335_vm1, %v854_v3, -1e+30  ;;  %v249_v3 = vld [vmem:[%s239_s14] sm:$0xff] }
 0x394   : > { %v508_v6 = vsel %vm335_vm1, %v494_v5, -1e+30  ;;  %v855_v7 = vpop.f32.mrb[6].mxu1  ;;  %v517_v13 = vsel %vm339_vm2, %v510_v10, -inf }
 0x395   : > { %v497_v8 = vpop.f32.mrb[7].mxu1  ;;  %v511_v9 = vsel %vm339_vm2, %v508_v6, -inf  ;;  %v250_v7 = vld [vmem:[%s239_s14 + $0x8] sm:$0xff] }
 0x396   : > { %v509_v11 = vsel %vm335_vm1, %v497_v8, -1e+30  ;;  %512 = vmax.xlane.f32.xlu1 %v511_v9 }
 0x397   : > { %v514_v12 = vsel %vm339_vm2, %v509_v11, -inf }
 0x398   : > { %515 = vmax.xlane.f32.xlu0 %v514_v12 }
 0x39a   : > { %518 = vmax.xlane.f32.xlu1 %v517_v13 }
 0x423   : > { %v513_v14 = vpop.xlane.xlu1 %512 }
 0x424   : > { %v520_v17 = vsub.f32 %v508_v6, %v513_v14 }
 0x425   : > { %v516_v15 = vpop.xlane.xlu0 %515 }
 0x426   : > { %v521_v18 = vsub.f32 %v509_v11, %v516_v15  ;;  %v523_v22 = vmul.f32 1.442695, %v520_v17 }
 0x427   : > { %v519_v19 = vpop.xlane.xlu1 %518 }
 0x428   : > { %v525_v20 = vmul.f32 1.442695, %v521_v18  ;;  %v522_v21 = vsub.f32 %v510_v10, %v519_v19 }
 0x42a   : > { %916 = vpow2.f32 %v525_v20  ;;  %v527_v23 = vmul.f32 1.442695, %v522_v21 }
 0x42c   : > { %918 = vpow2.f32 %v527_v23 }
 0x42d   : > { %920 = vpow2.f32 %v523_v22 }
 0x434   : > { %v917_v16 = vpop.eup %916 }
 0x435   : > { %v532_v24 = vsel %vm339_vm2, %v917_v16, 0.0 }
 0x436   : > { %v919_v25 = vpop.eup %918  ;;  %533 = vadd.xlane.f32.xlu1 %v532_v24 }
 0x437   : > { %v535_v26 = vsel %vm339_vm2, %v919_v25, 0.0  ;;  %v921_v27 = vpop.eup %920 }
 0x438   : > { %536 = vadd.xlane.f32.xlu0 %v535_v26  ;;  %v529_v28 = vsel %vm339_vm2, %v921_v27, 0.0 }
 0x43c   : > { %530 = vadd.xlane.f32.xlu0 %v529_v28 }
 0x447   : > { %546 = vrot.lane.b32.xlu1 %v986_v0, %s940_s28 }
 0x452   : > { %548 = vrot.lane.b32.xlu0 %v991_v4, %s940_s28 }
 0x4c3   : > { %v534_v29 = vpop.xlane.xlu1 %533 }
 0x4c5   : > { %v537_v30 = vpop.xlane.xlu0 %536 }
 0x4c6   : > { %922 = vrcp.f32 %v537_v30 }
 0x4c7   : > { %v547_v31 = vpop.permute.xlu1 %546  ;;  %924 = vrcp.f32 %v534_v29 }
 0x4c8   : > { %856 = vmatprep.subr.bf16.mxu0 %v547_v31 }
 0x4c9   : > { %v531_v32 = vpop.xlane.xlu0 %530  ;;  %857 = vmatpush3.bf16.msra.mxu0 %v547_v31 }
 0x4ca   : > { %926 = vrcp.f32 %v531_v32 }
 0x4cd   : > { %v549_v33 = vpop.permute.xlu0 %548 }
 0x4ce   : > { %v558_v34 = vsel %vm386_vm3, %v549_v33, 0  ;;  %877 = vmatprep.subr.msk.bf16.mxu0 %vm386_vm3, %v549_v33 }
 0x4cf   : > { %859 = vmatpush3.bf16.msra.mxu0 %v558_v34 }
 0x4d0   : > { %v923_v35 = vpop.eup %922  ;;  %864 = vmatprep.subr.bf16.mxu0 %v901_v41 }
 0x4d1   : > { %v925_v36 = vpop.eup %924  ;;  %v543_v37 = vmul.f32 %v923_v35, %v919_v25 }
 0x4d2   : > { %v542_v38 = vmul.f32 %v925_v36, %v917_v16 }
 0x4d3   : > { %v545_v40 = vpack.c.bf16 %v543_v37, %v543_v37 }
 0x4d4   : > { %v927_v0 = vpop.eup %926 }
 0x4d5   : > { %v541_v4 = vmul.f32 %v927_v0, %v921_v27 }
 0x4d7   : > { %v544_v39 = vpack.c.bf16 %v542_v38, %v541_v4 }
 0x4d9   : > { %860 = vmatprep.mubr.msk.bf16.mxu0 %vm339_vm2, %v544_v39 }
 0x4da   : > { %861 = vmatmul.mubr.msk.bf16.vlgmr.msra.gmra.mrb[4].mxu0 %vm339_vm2, %v545_v40 }
 0x4db   : > { %865 = vmatpush3.bf16.msra.mxu0 %v901_v41 }
 0x4dc   : > { %866 = vmatprep.subr.bf16.mxu0 %v902_v42 }
 0x4df   : > { %867 = vmatpush3.bf16.msra.mxu0 %v902_v42 }
 0x5ad   : > { %v862_v43 = vpop.f32.mrb[4].mxu0 }
 0x5ae   : > { %v594_v44 = vpop.f32.mrb[5].mxu0 }
 0x5af   : > { %v863_v45 = vpop.f32.mrb[6].mxu0 }
 0x5b0   : > { %v597_v46 = vpop.f32.mrb[7].mxu0 }
 0x5b1   : > { %v894_v47 = vpack.i.bf16 %v597_v46, %v594_v44 }
 0x5b3   : > { %895 = vrot.lane.b32.xlu1 %v894_v47, %s941_s8 }
 0x5b7   : > { %615 = vrot.lane.b32.xlu1 %v862_v43, %s941_s8 }
 0x625   : > { %v896_v48 = vpop.permute.xlu1 %895 }
 0x626   : > { %v898_v49 = vunpack.i.h.bf16 %v896_v48  ;;  %v897_v50 = vunpack.i.l.bf16 %v896_v48 }
 0x628   : > { %v621_v51 = vsel %vm272_vm0, %v1037_v2, %v898_v49  ;;  %v620_v52 = vsel %vm272_vm0, %v1035_v63, %v897_v50 }
 0x629   : > { %v623_v53 = vpack.c.bf16 %v621_v51, %v620_v52  ;;  %v616_v54 = vpop.permute.xlu1 %615 }
 0x62a   : > { %v622_v55 = vsel %vm272_vm0, %v1033_v62, %v616_v54  ;;  %v251_v62 = vld [vmem:[%s239_s14 + $0x10] sm:$0xff] }
 0x62b   : > { %v624_v56 = vpack.c.bf16 %v622_v55, %v622_v55  ;;  %868 = vmatprep.mubr.msk.bf16.mxu0 %vm648_vm4, %v623_v53 }
 0x62d   : > { %869 = vmatmul.mubr.msk.bf16.vlgmr.msra.gmra.mrb[8].mxu0 %vm648_vm4, %v624_v56 }
 0x700   : > { %v870_v58 = vpop.f32.mrb[8].mxu0 }
 0x701   : > { %v698_v60 = vadd.f32 %v870_v58, %v804_v57  ;;  %v689_v61 = vpop.f32.mrb[9].mxu0 }
 0x702   : > { %v690_v63 = vadd.f32 %v804_v57, %v689_v61  ;;  %v871_v1 = vpop.f32.mrb[10].mxu0 }
 0x703   : > { %v712_v2 = vmul.f32 %v809_v59, %v698_v60  ;;  %v692_v5 = vpop.f32.mrb[11].mxu0 }
 0x704   : > { %v710_v6 = vmul.f32 %v809_v59, %v690_v63  ;;  %v693_v8 = vadd.f32 %v804_v57, %v692_v5 }
 0x705   : > { %v715_v9 = vadd.f32 %v712_v2, %v251_v62 }
 0x706   : > { %v713_v10 = vadd.f32 %v710_v6, %v249_v3  ;;  %v711_v11 = vmul.f32 %v809_v59, %v693_v8 }
 0x707   : > { %718 = vst.msk [vmem:[%s244_s20 + $0x10] sm:$0xff] %vm648_vm4, %v715_v9 }
 0x708   : > { %v714_v12 = vadd.f32 %v711_v11, %v250_v7  ;;  %716 = vst.msk [vmem:[%s244_s20] sm:$0xff] %vm648_vm4, %v713_v10 }
 0x70a   : > { %717 = vst.msk [vmem:[%s244_s20 + $0x8] sm:$0xff] %vm648_vm4, %v714_v12 }
 0x70b PF: > { %s15_s18 = sadd.s32 1, %s934_s18  }
 0x70c   : > { %p12_p4 = scmp.ge.s32.totalorder %s15_s18, 4  }
 0x70e   :  { %14 = sbr.rel (!%p12_p4) target bundleno = 1 (0x1), region = 73 }

// kernel: dino_v2_forward.11
= control target key start
LH: loop header
LB: loop body
LE: loop exit
PB: predicated region body
PF: predicated region fallthrough
CT: control target
= control target key end

     0   :  { %s776_s27 = smov 0   ;;  %s862_s0 = inlined_call_operand.vmem [shape: f32[48,32], index: 0, kind: input, shape index: {}, may-alias: {0,8}]   ;;  %s863_s1 = inlined_call_operand.vmem [shape: f32[1,32], index: 1, kind: input, shape index: {}]   ;;  %s864_s2 = inlined_call_operand.vmem [shape: f32[1,32], index: 2, kind: input, shape index: {}]   ;;  %s865_s3 = inlined_call_operand.vmem [shape: bf16[32,128], index: 3, kind: input, shape index: {}]   ;;  %s866_s4 = inlined_call_operand.vmem [shape: f32[1,128], index: 4, kind: input, shape index: {}]   ;;  %s867_s5 = inlined_call_operand.vmem [shape: bf16[128,32], index: 5, kind: input, shape index: {}]   ;;  %s868_s6 = inlined_call_operand.vmem [shape: f32[1,32], index: 6, kind: input, shape index: {}]   ;;  %s869_s7 = inlined_call_operand.vmem [shape: f32[1,32], index: 7, kind: input, shape index: {}]   ;;  %s870_s8 = inlined_call_operand.vmem [shape: f32[48,32], index: 8, kind: output, shape index: {}, may-alias: {0,8}]  }
   0x1 LB: > { %s626_s28 = sadd.s32 4294967295, %s727_s27   ;;  %p630_p0 = scmp.ge.s32.totalorder %s727_s27, 1  ;;  %s727_s27 = sphi %s776_s27, %s18_s27  }
   0x2   : > { %p263_p1 = scmp.lt.s32.totalorder %s727_s27, 4 }
   0x4   : > { %p264_p2 = pnand %p630_p0, %p263_p1 }
   0x5   : > { %s631_s29 = sshll.u32 (!%p264_p2), %s626_s28, 1  ;;  %vm312_vm0 = vcmask (!%p264_p2), 261120   ;;  %v703_v14 = vld [vmem:[%s865_s3] sm:$0xff] (!%p264_p2)   ;;  %v729_v15 = vmov (!%p264_p2), 0.0   ;;  %v704_v16 = vld [vmem:[%s865_s3 + $0x8] sm:$0xff] (!%p264_p2)   ;;  %vm730_vm1 = vmmov (!%p264_p2), 0  }
   0x6   : > { %267 = sbr.rel (%p264_p2) target bundleno = 802 (0x322), region = 52  ;;  %p298_p3 = scmp.lt.s32.totalorder (!%p264_p2), %s631_s29, 5  ;;  %665 = vmatprep.subr.bf16.mxu0 (!%p264_p2), %v729_v15  ;;  %673 = vmatprep.subr.bf16.mxu1 (!%p264_p2), %v729_v15  ;;  %v635_v25 = vld [vmem:[%s863_s1] ss:$0 sm:$0xff] (!%p264_p2)  ;;  %v706_v35 = vld [vmem:[%s867_s5 + $0x8] sm:$0xff] (!%p264_p2)   ;;  %v707_v36 = vld [vmem:[%s867_s5 + $0x10] sm:$0xff] (!%p264_p2)  }
   0x7   : > { %666 = vmatpush3.bf16.msra.mxu0 (!%p264_p2), %v703_v14  ;;  %669 = vmatprep.mubr.msk.bf16.mxu0 (!%p264_p2), %vm730_vm1, %v729_v15  ;;  %v636_v29 = vld [vmem:[%s864_s2] ss:$0 sm:$0xff] (!%p264_p2)  ;;  %v708_v37 = vld [vmem:[%s867_s5 + $0x18] sm:$0xff] (!%p264_p2)   ;;  %v710_v39 = vld [vmem:[%s867_s5 + $0x28] sm:$0xff] (!%p264_p2)  }
   0x8   : > { %667 = vmatprep.subr.bf16.mxu0 (!%p264_p2), %v729_v15  ;;  %689 = vmatprep.mubr.msk.bf16.mxu1 (!%p264_p2), %vm730_vm1, %v729_v15  ;;  %v705_v34 = vld [vmem:[%s867_s5] sm:$0xff] (!%p264_p2)   ;;  %v711_v40 = vld [vmem:[%s867_s5 + $0x30] sm:$0xff] (!%p264_p2)   ;;  %v712_v41 = vld [vmem:[%s867_s5 + $0x38] sm:$0xff] (!%p264_p2)  }
   0x9   : > { %674 = vmatpush3.bf16.msra.mxu1 (!%p264_p2), %v705_v34  ;;  %v709_v38 = vld [vmem:[%s867_s5 + $0x20] sm:$0xff] (!%p264_p2)  }
   0xa   : > { %675 = vmatprep.subr.bf16.mxu1 (!%p264_p2), %v729_v15  ;;  %v637_v42 = vld [vmem:[%s866_s4] ss:$0 sm:$0xff] (!%p264_p2) }
   0xb   : > { %668 = vmatpush3.bf16.msra.mxu0 (!%p264_p2), %v704_v16 }
   0xd   : > { %s872_s29 = smov (!%p298_p3, %s631_s29), 5  ;;  %676 = vmatpush3.bf16.msra.mxu1 %v706_v35 }
   0xe   : > { %s632_s30 = sshll.u32 %s872_s29, 3  ;;  %677 = vmatprep.subr.bf16.mxu1 %v729_v15 }
   0xf   : > { %s301_s11 = scalar_lea.vmem %s862_s0, %s632_s30  ;;  %s307_s25 = scalar_lea.vmem %s870_s8, %s632_s30 }
  0x10   : > { %v792_v0 = vld [vmem:[%s301_s11] sm:$0xff]  ;;  %v794_v1 = vld [vmem:[%s301_s11 + $0x8] sm:$0xff] }
  0x11   : > { %v313_v2 = vsel %vm312_vm0, %v792_v0, 0.0  ;;  %v316_v3 = vsel %vm312_vm0, %v794_v1, 0.0  ;;  %678 = vmatpush3.bf16.msra.mxu1 %v707_v36 }
  0x12   : > { %314 = vadd.xlane.f32.xlu0 %v313_v2  ;;  %679 = vmatprep.subr.bf16.mxu1 %v729_v15 }
  0x15   : > { %680 = vmatpush3.bf16.msra.mxu1 %v708_v37 }
  0x16   : > { %317 = vadd.xlane.f32.xlu0 %v316_v3  ;;  %681 = vmatprep.subr.bf16.mxu1 %v729_v15 }
  0x19   : > { %682 = vmatpush3.bf16.msra.mxu1 %v709_v38 }
  0x1a   : > { %683 = vmatprep.subr.bf16.mxu1 %v729_v15 }
  0x1d   : > { %684 = vmatpush3.bf16.msra.mxu1 %v710_v39 }
  0x1e   : > { %685 = vmatprep.subr.bf16.mxu1 %v729_v15 }
  0x21   : > { %686 = vmatpush3.bf16.msra.mxu1 %v711_v40 }
  0x22   : > { %687 = vmatprep.subr.bf16.mxu1 %v729_v15 }
  0x25   : > { %688 = vmatpush3.bf16.msra.mxu1 %v712_v41 }
  0x9f   : > { %v315_v4 = vpop.xlane.xlu0 %314 }
  0xa0   : > { %v320_v5 = vmul.f32 0.03125, %v315_v4 }
  0xa2   : > { %v322_v6 = vsub.f32 %v792_v0, %v320_v5 }
  0xa3   : > { %v318_v7 = vpop.xlane.xlu0 %317 }
  0xa4   : > { %v321_v8 = vmul.f32 0.03125, %v318_v7  ;;  %v324_v9 = vmul.f32 %v322_v6, %v322_v6 }
  0xa6   : > { %v323_v10 = vsub.f32 %v794_v1, %v321_v8  ;;  %v326_v11 = vsel %vm312_vm0, %v324_v9, 0.0  ;;  %v650_v8 = vld [vmem:[%s869_s7] ss:$0 sm:$0xff] }
  0xa7   : > { %327 = vadd.xlane.f32.xlu1 %v326_v11 }
  0xa8   : > { %v325_v12 = vmul.f32 %v323_v10, %v323_v10 }
  0xaa   : > { %v329_v13 = vsel %vm312_vm0, %v325_v12, 0.0 }
  0xab   : > { %330 = vadd.xlane.f32.xlu1 %v329_v13 }
 0x134   : > { %v328_v17 = vpop.xlane.xlu1 %327 }
 0x135   : > { %v332_v18 = vmul.f32 0.03125, %v328_v17 }
 0x137   : > { %v334_v19 = vadd.f32 1e-06, %v332_v18 }
 0x138   : > { %v331_v20 = vpop.xlane.xlu1 %330 }
 0x139   : > { %713 = vrsqrt.f32 %v334_v19  ;;  %v333_v21 = vmul.f32 0.03125, %v331_v20 }
 0x13b   : > { %v335_v22 = vadd.f32 1e-06, %v333_v21 }
 0x13d   : > { %715 = vrsqrt.f32 %v335_v22 }
 0x143   : > { %v714_v23 = vpop.eup %713 }
 0x144   : > { %v338_v24 = vmul.f32 %v714_v23, %v322_v6  ;;  %v641_v6 = vld [vmem:[%s868_s6] ss:$0 sm:$0xff] }
 0x146   : > { %v347_v28 = vmul.f32 %v635_v25, %v338_v24 }
 0x147   : > { %v716_v26 = vpop.eup %715 }
 0x148   : > { %v339_v27 = vmul.f32 %v716_v26, %v323_v10  ;;  %v356_v31 = vadd.f32 %v636_v29, %v347_v28 }
 0x14a   : > { %v348_v30 = vmul.f32 %v635_v25, %v339_v27 }
 0x14c   : > { %v357_v32 = vadd.f32 %v636_v29, %v348_v30 }
 0x14e   : > { %v358_v33 = vpack.c.bf16 %v357_v32, %v356_v31 }
 0x150   : > { %670 = vmatmul.mubr.msk.bf16.vlgmr.msra.gmra.mrb[0].mxu0 %vm312_vm0, %v358_v33 }
 0x223   : > { %v419_v43 = vpop.f32.mrb[0].mxu0 }
 0x224   : > { %v420_v44 = vadd.f32 %v637_v42, %v419_v43  ;;  %v671_v45 = vpop.f32.mrb[1].mxu0 }
 0x225   : > { %v422_v46 = vpop.f32.mrb[2].mxu0 }
 0x226   : > { %v426_v47 = vmul.f32 %v420_v44, %v420_v44  ;;  %v423_v48 = vadd.f32 %v637_v42, %v422_v46  ;;  %v672_v49 = vpop.f32.mrb[3].mxu0 }
 0x228   : > { %v428_v50 = vmul.f32 %v426_v47, %v420_v44  ;;  %v427_v51 = vmul.f32 %v423_v48, %v423_v48 }
 0x22a   : > { %v430_v52 = vmul.f32 0.044715, %v428_v50  ;;  %v429_v53 = vmul.f32 %v427_v51, %v423_v48 }
 0x22c   : > { %v432_v54 = vadd.f32 %v430_v52, %v420_v44  ;;  %v431_v55 = vmul.f32 0.044715, %v429_v53 }
 0x22e   : > { %v434_v56 = vmul.f32 0.7978846, %v432_v54  ;;  %v433_v57 = vadd.f32 %v431_v55, %v423_v48 }
 0x230   : > { %717 = vtanh.f32 %v434_v56  ;;  %v435_v58 = vmul.f32 0.7978846, %v433_v57 }
 0x232   : > { %719 = vtanh.f32 %v435_v58 }
 0x23a   : > { %v718_v59 = vpop.eup %717 }
 0x23b   : > { %v438_v60 = vadd.f32 1.0, %v718_v59 }
 0x23c   : > { %v720_v61 = vpop.eup %719 }
 0x23d   : > { %v439_v62 = vadd.f32 1.0, %v720_v61  ;;  %v440_v63 = vmul.f32 0.5, %v438_v60 }
 0x23f   : > { %v441_v2 = vmul.f32 0.5, %v439_v62  ;;  %v442_v3 = vmul.f32 %v440_v63, %v420_v44 }
 0x241   : > { %v443_v4 = vmul.f32 %v441_v2, %v423_v48 }
 0x243   : > { %v444_v5 = vpack.c.bf16 %v443_v4, %v442_v3 }
 0x245   : > { %690 = vmatmul.mubr.bf16.vlgmr.msra.gmra.mrb[0].mxu1 %v444_v5 }
 0x318   : > { %v550_v7 = vpop.f32.mrb[0].mxu1 }
 0x319   : > { %v551_v9 = vadd.f32 %v641_v6, %v550_v7  ;;  %v691_v10 = vpop.f32.mrb[1].mxu1 }
 0x31a   : > { %v553_v11 = vpop.f32.mrb[2].mxu1 }
 0x31b   : > { %v564_v12 = vmul.f32 %v650_v8, %v551_v9  ;;  %v554_v13 = vadd.f32 %v641_v6, %v553_v11  ;;  %v692_v14 = vpop.f32.mrb[3].mxu1 }
 0x31d   : > { %v566_v15 = vadd.f32 %v564_v12, %v792_v0  ;;  %v565_v16 = vmul.f32 %v650_v8, %v554_v13 }
 0x31f   : > { %568 = vst.msk [vmem:[%s307_s25] sm:$0xff] %vm312_vm0, %v566_v15  ;;  %v567_v17 = vadd.f32 %v565_v16, %v794_v1 }
 0x321   : > { %569 = vst.msk [vmem:[%s307_s25 + $0x8] sm:$0xff] %vm312_vm0, %v567_v17 }
 0x322 PF: > { %s18_s27 = sadd.s32 1, %s727_s27  }
 0x323   : > { %p15_p4 = scmp.ge.s32.totalorder %s18_s27, 5  }
 0x325   :  { %17 = sbr.rel (!%p15_p4) target bundleno = 1 (0x1), region = 82 }

// kernel: dino_v2_forward.15
= control target key start
LH: loop header
LB: loop body
LE: loop exit
PB: predicated region body
PF: predicated region fallthrough
CT: control target
= control target key end

     0   :  { %vm23_vm0 = vcmask 254976   ;;  %s267_s0 = inlined_call_operand.vmem [shape: f32[2,32], index: 0, kind: input, shape index: {}]   ;;  %s268_s1 = inlined_call_operand.vmem [shape: f32[1,32], index: 1, kind: input, shape index: {}]   ;;  %s269_s2 = inlined_call_operand.vmem [shape: f32[1,32], index: 2, kind: input, shape index: {}]   ;;  %s270_s3 = inlined_call_operand.vmem [shape: bf16[32,8], index: 3, kind: input, shape index: {}]   ;;  %s271_s4 = inlined_call_operand.vmem [shape: f32[1,8], index: 4, kind: input, shape index: {}]   ;;  %s272_s5 = inlined_call_operand.hbm [shape: f32[2,8], index: 5, kind: output, shape index: {}]  }
   0x1   :  { %v22_v0 = vld [vmem:[%s267_s0] sm:$0x3] }
   0x2   :  { %v24_v1 = vsel %vm23_vm0, %v22_v0, 0.0 }
   0x3   :  { %25 = vadd.xlane.f32.xlu0 %v24_v1 }
   0x4   :  { %10 = vsyncpa [#allocation3], 0  ;;  %v169_v7 = vld [vmem:[%s270_s3] sm:$0xff]   ;;  %v201_v8 = vmov 0.0   ;;  %v170_v9 = vld [vmem:[%s270_s3 + $0x8] sm:$0xff]   ;;  %vm202_vm1 = vmmov 0  }
   0x5   :  { %158 = vmatprep.subr.bf16.mxu0 %v201_v8  ;;  %162 = vmatprep.mubr.msk.bf16.mxu0 %vm202_vm1, %v201_v8  ;;  %v149_v14 = vld [vmem:[%s268_s1] ss:$0 sm:$0xff]  ;;  %vm78_vm2 = vcmask 261120   ;;  %vm122_vm3 = vcmask 58368   ;;  %s203_s1 = smov [#allocation2]  }
   0x6   :  { %159 = vmatpush3.bf16.msra.mxu0 %v169_v7  ;;  %v150_v16 = vld [vmem:[%s269_s2] ss:$0 sm:$0xff]  ;;  %s141_s2 = sshll.u32 %s203_s1, 4  ;;  %s142_s2 = int_to_ptr.vmem [resolvable:$true] %s141_s2 }
   0x7   :  { %160 = vmatprep.subr.bf16.mxu0 %v201_v8  ;;  %v151_v20 = vld [vmem:[%s271_s4] ss:$0 sm:$0xff]  ;;  %s177_s4 = scalar_lea.vmem %s142_s2, 32  ;;  %p182_p1 = scmp.lt.s32.totalorder %s142_s2, %s142_s2 }
   0x8   :  { %p178_p0 = scmp.ne.s32.totalorder %s142_s2, %s177_s4  ;;  %p183_p2 = scmp.lt.s32.totalorder %s177_s4, %s177_s4 }
   0xa   :  { %161 = vmatpush3.bf16.msra.mxu0 %v170_v9  ;;  %p184_p3 = por %p183_p2, %p182_p1 }
   0xc   :  { %p185_p4 = pnand %p184_p3, %p178_p0 }
  0x90   :  { %v26_v2 = vpop.xlane.xlu0 %25 }
  0x91   :  { %v28_v3 = vmul.f32 0.03125, %v26_v2 }
  0x93   :  { %v29_v4 = vsub.f32 %v22_v0, %v28_v3 }
  0x95   :  { %v30_v5 = vmul.f32 %v29_v4, %v29_v4 }
  0x97   :  { %v31_v6 = vsel %vm23_vm0, %v30_v5, 0.0 }
  0x98   :  { %32 = vadd.xlane.f32.xlu0 %v31_v6 }
 0x125   :  { %v33_v10 = vpop.xlane.xlu0 %32 }
 0x126   :  { %v34_v11 = vmul.f32 0.03125, %v33_v10 }
 0x128   :  { %v35_v12 = vadd.f32 1e-06, %v34_v11 }
 0x12a   :  { %171 = vrsqrt.f32 %v35_v12 }
 0x134   :  { %v172_v13 = vpop.eup %171 }
 0x135   :  { %v37_v15 = vmul.f32 %v172_v13, %v29_v4 }
 0x137   :  { %v45_v17 = vmul.f32 %v149_v14, %v37_v15 }
 0x139   :  { %v53_v18 = vadd.f32 %v150_v16, %v45_v17 }
 0x13b   :  { %v54_v19 = vpack.c.bf16 %v53_v18, %v53_v18 }
 0x13d   :  { %163 = vmatmul.mubr.msk.bf16.vlgmr.msra.gmra.mrb[0].mxu0 %vm78_vm2, %v54_v19 }
 0x210   :  { %v116_v21 = vpop.f32.mrb[0].mxu0 }
 0x211   :  { %v117_v22 = vadd.f32 %v151_v20, %v116_v21  ;;  %v164_v23 = vpop.f32.mrb[1].mxu0 }
 0x212   :  { %v119_v24 = vpop.f32.mrb[2].mxu0 }
 0x213   :  { %v165_v25 = vpop.f32.mrb[3].mxu0  ;;  %v123_v26 = vsel %vm122_vm3, %v117_v22, -inf }
 0x214   :  { %124 = vmax.xlane.f32.xlu1 %v123_v26 }
 0x2a1   :  { %v125_v27 = vpop.xlane.xlu1 %124 }
 0x2a2   :  { %v126_v28 = vsub.f32 %v117_v22, %v125_v27 }
 0x2a4   :  { %v127_v29 = vmul.f32 1.442695, %v126_v28 }
 0x2a6   :  { %173 = vpow2.f32 %v127_v29 }
 0x2b0   :  { %v174_v30 = vpop.eup %173 }
 0x2b1   :  { %v129_v31 = vsel %vm122_vm3, %v174_v30, 0.0 }
 0x2b2   :  { %130 = vadd.xlane.f32.xlu1 %v129_v31 }
 0x33f   :  { %v131_v32 = vpop.xlane.xlu1 %130 }
 0x340   :  { %175 = vrcp.f32 %v131_v32 }
 0x34a   :  { %v176_v33 = vpop.eup %175 }
 0x34b   :  { %v133_v34 = vmul.f32 %v176_v33, %v174_v30 }
 0x34d   :  { %134 = vst.msk [vmem:[#allocation2] sm:$0x3] %vm122_vm3, %v133_v34 }
 0x34e   :  { %188 = shalt.err (!%p185_p4)
}
 0x34f   :  { %s189_s30 = scalar_lea.hbm %s272_s5, 32 }
 0x350   :  { %p190_p5 = scmp.ne.s32.totalorder %s272_s5, %s189_s30  ;;  %p193_p6 = scmp.lt.u32.totalorder %s189_s30, %s272_s5 }
 0x352   :  { %p195_p7 = pnand %p193_p6, %p190_p5 }
 0x354   :  { %198 = shalt.err (!%p195_p7)
}
 0x355   :  { %144 = dma.vmem_to_hbm [thread:$0]  %s142_s2, 32, %s272_s5, [#allocation3]  }
 0x356   :  { %199 = dma.done.wait [#allocation3], 32  }
 0x357   :  { %200 = vsyncadd [#allocation3], 4294967264 }
 0x358   :  { %148 = vsyncpa [#allocation3], 1 }

</bundles_post_ra>
